<compile_context>
chip_gen: v7x
topology: tpu7x:2x2x1
jax: 0.10.0
libtpu: 0.0.40
codegen_flags: <defaults>
</compile_context>

<pallas_src>
import jax
import jax.numpy as jnp
from jax.experimental import pallas as pl
from jax.experimental.pallas import tpu as pltpu


def _gru_seq_kernel(
    x3_ref,      # (T*B, 3D) bf16  replicated + dropout-masked input slab
    mask_ref,    # (T, B, 1) f32   per-step sequence-valid mask
    hmask_ref,   # (B, 3H)   f32   packed hidden dropout masks [hr | hi | hn]
    wx_ref,      # (3D, 3H)  bf16  block-diag(W_ir, W_ii, W_in)
    wh_ref,      # (3H, 3H)  bf16  block-diag(W_hr, W_hi, W_hn)
    b_ref,       # (1, 3H)   f32   packed biases [b_ir | b_ii | b_in]
    h0_ref,      # (B, H)    f32   initial hidden state
    hseq_ref,    # (T, B, H) f32   output: h_t for every step (single writeback)
    gx_scr,      # (T*B, 3H) f32   VMEM scratch: precomputed input-side gates
):
    f32 = jnp.float32
    bf16 = jnp.bfloat16
    T, B, H = hseq_ref.shape

    # ---- Pre-pass (off the recurrent critical path): input-side projection for
    # ALL timesteps as one batched MXU matmul, accumulated in f32.
    gx_scr[...] = (
        jnp.dot(x3_ref[...], wx_ref[...], preferred_element_type=f32)
        + b_ref[...].astype(f32))

    # Loop-invariant values hoisted out of the recurrence.
    hm = hmask_ref[...].astype(f32)      # (B, 3H)
    wh = wh_ref[...]                     # (3H, 3H) bf16
    h0 = h0_ref[...].astype(f32)         # (B, H)

    def step(t, hx):
        m = mask_ref[t].astype(f32)                        # (B, 1)
        off = pl.multiple_of(t * B, B)                     # sublane-aligned start
        gx = gx_scr[pl.ds(off, B), :]                      # (B, 3H) f32

        # Hidden-side fused gates: concat([h,h,h]) * hmask @ block-diag(Wh).
        # TODO(synk): replace the per-step lane concat with stores into a persistent
        # (B,3H) scratch to move it off the VALU/XLU critical path (small win).
        h3 = jnp.concatenate([hx, hx, hx], axis=-1) * hm   # (B, 3H) f32
        gh = jnp.dot(h3.astype(bf16), wh, preferred_element_type=f32)

        r = jax.nn.sigmoid(gx[:, 0:H] + gh[:, 0:H])
        i = jax.nn.sigmoid(gx[:, H:2 * H] + gh[:, H:2 * H])
        n = jnp.tanh(gx[:, 2 * H:3 * H] + r * gh[:, 2 * H:3 * H])

        # h_new = (1-i)*n + i*hx      == n + i*(hx - n)
        h_new = n + i * (hx - n)
        # h_out = h_new*m + hx*(1-m)  == hx + m*(h_new - hx)
        h_out = hx + m * (h_new - hx)

        hseq_ref[t] = h_out.astype(hseq_ref.dtype)
        return h_out

    jax.lax.fori_loop(0, T, step, h0, unroll=True)


def _block_diag3(a, b, c):
    n0, m0 = a.shape
    n1, m1 = b.shape
    n2, m2 = c.shape
    out = jnp.zeros((n0 + n1 + n2, m0 + m1 + m2), a.dtype)
    out = out.at[:n0, :m0].set(a)
    out = out.at[n0:n0 + n1, m0:m0 + m1].set(b)
    out = out.at[n0 + n1:, m0 + m1:].set(c)
    return out


def bayesian_gru_sequence(x, h0, mask, drop_masks, params):
    """Run T steps of BayesianGRUCell with the time loop inside ONE pallas_call.

    x    : (T, B, D_in)
    h0   : (B, H)
    mask : (T, B, 1)
    drop_masks: dict ir/ii/in_ (B, D_in), hr/hi/hn (B, H)  (inverted-dropout
                scaled, sampled once per sequence -- SequentialDropout)
    params: W_ir/W_ii/W_in (D_in, H), W_hr/W_hi/W_hn (H, H), b_* (1, H)
            (weights stored pre-transposed so the kernel does act @ W)
    Returns (T, B, H): hidden state after every step.
    """
    T, B, D = x.shape
    H = h0.shape[1]
    f32, bf16 = jnp.float32, jnp.bfloat16

    # Host/XLA-side one-time packing (amortized over the whole sequence).
    imask = jnp.concatenate(
        [drop_masks["ir"], drop_masks["ii"], drop_masks["in_"]], axis=-1)   # (B, 3D)
    hmask = jnp.concatenate(
        [drop_masks["hr"], drop_masks["hi"], drop_masks["hn"]], axis=-1)    # (B, 3H)
    # Replicated + dropout-masked input slab, flattened so the whole input-side
    # projection is a single (T*B, 3D) @ (3D, 3H) MXU matmul inside the kernel.
    x3 = (jnp.concatenate([x, x, x], axis=-1) * imask[None]).reshape(T * B, 3 * D)
    wx = _block_diag3(params["W_ir"], params["W_ii"], params["W_in"])       # (3D, 3H)
    wh = _block_diag3(params["W_hr"], params["W_hi"], params["W_hn"])       # (3H, 3H)
    b = jnp.concatenate(
        [params["b_ir"], params["b_ii"], params["b_in"]], axis=-1)          # (1, 3H)

    grid_spec = pltpu.PrefetchScalarGridSpec(
        num_scalar_prefetch=0,
        grid=(1,),                                   # single invocation, all-resident
        in_specs=[
            pl.BlockSpec((T * B, 3 * D), lambda i: (0, 0)),      # x3     resident
            pl.BlockSpec((T, B, 1), lambda i: (0, 0, 0)),        # mask   resident
            pl.BlockSpec((B, 3 * H), lambda i: (0, 0)),          # hmask  resident
            pl.BlockSpec((3 * D, 3 * H), lambda i: (0, 0)),      # Wx     resident
            pl.BlockSpec((3 * H, 3 * H), lambda i: (0, 0)),      # Wh     resident
            pl.BlockSpec((1, 3 * H), lambda i: (0, 0)),          # b      resident
            pl.BlockSpec((B, H), lambda i: (0, 0)),              # h0     resident
        ],
        out_specs=pl.BlockSpec((T, B, H), lambda i: (0, 0, 0)),  # single writeback
        scratch_shapes=[pltpu.VMEM((T * B, 3 * H), jnp.float32)],
    )

    return pl.pallas_call(
        _gru_seq_kernel,
        out_shape=jax.ShapeDtypeStruct((T, B, H), f32),
        grid_spec=grid_spec,
        compiler_params=pltpu.CompilerParams(
            dimension_semantics=("arbitrary",)),
    )(x3.astype(bf16), mask.astype(f32), hmask.astype(f32),
      wx.astype(bf16), wh.astype(bf16), b.astype(f32), h0.astype(f32))


def _init_linear(key, in_features, out_features, with_bias):
    # Mimic torch.nn.Linear default init: U(-1/sqrt(fan_in), 1/sqrt(fan_in)).
    k1, k2 = jax.random.split(key)
    bound = 1.0 / jnp.sqrt(jnp.float32(in_features))
    w = jax.random.uniform(k1, (in_features, out_features), jnp.float32,
                           -bound, bound)
    b = (jax.random.uniform(k2, (1, out_features), jnp.float32, -bound, bound)
         if with_bias else jnp.zeros((1, out_features), jnp.float32))
    return w, b


if __name__ == "__main__":
    T, B, D_IN, H = 8, 8, 32, 32
    DROPOUT = 0.25

    key = jax.random.PRNGKey(0)
    keys = jax.random.split(key, 18)

    # Parameters (deterministic).
    W_ir, b_ir = _init_linear(keys[0], D_IN, H, True)
    W_ii, b_ii = _init_linear(keys[1], D_IN, H, True)
    W_in, b_in = _init_linear(keys[2], D_IN, H, True)
    W_hr, _ = _init_linear(keys[3], H, H, False)   # bias_hh=False
    W_hi, _ = _init_linear(keys[4], H, H, False)
    W_hn, _ = _init_linear(keys[5], H, H, False)
    params = dict(W_ir=W_ir, W_ii=W_ii, W_in=W_in,
                  W_hr=W_hr, W_hi=W_hi, W_hn=W_hn,
                  b_ir=b_ir, b_ii=b_ii, b_in=b_in)

    # Inputs.
    x = jax.random.normal(keys[6], (T, B, D_IN), jnp.float32)
    h0 = jax.random.normal(keys[7], (B, H), jnp.float32)
    # Per-step sequence-valid mask (0/1), shape (T, B, 1).
    mask = (jax.random.uniform(keys[8], (T, B, 1)) > 0.2).astype(jnp.float32)

    # SequentialDropout: one Bernoulli mask per gate, reused across the sequence,
    # inverted-dropout scaled (as F.dropout with training=True).
    def drop_mask(k, shape):
        keep = (jax.random.uniform(k, shape) >= DROPOUT).astype(jnp.float32)
        return keep / (1.0 - DROPOUT)

    drop_masks = dict(
        ir=drop_mask(keys[9], (B, D_IN)),
        ii=drop_mask(keys[10], (B, D_IN)),
        in_=drop_mask(keys[11], (B, D_IN)),
        hr=drop_mask(keys[12], (B, H)),
        hi=drop_mask(keys[13], (B, H)),
        hn=drop_mask(keys[14], (B, H)),
    )

    hs = bayesian_gru_sequence(x, h0, mask, drop_masks, params)
    hs = jax.block_until_ready(hs)

    # Pure-JAX f32 reference: unrolled loop of the original per-step forward.
    def ref_sequence():
        h = h0
        outs = []
        for t in range(T):
            r = jax.nn.sigmoid((x[t] * drop_masks["ir"]) @ W_ir + b_ir
                               + (h * drop_masks["hr"]) @ W_hr)
            i = jax.nn.sigmoid((x[t] * drop_masks["ii"]) @ W_ii + b_ii
                               + (h * drop_masks["hi"]) @ W_hi)
            n = jnp.tanh((x[t] * drop_masks["in_"]) @ W_in + b_in
                         + r * ((h * drop_masks["hn"]) @ W_hn))
            h_new = (1 - i) * n + i * h
            h = h_new * mask[t] + h * (1 - mask[t])
            outs.append(h)
        return jnp.stack(outs)

    ref = ref_sequence()
    # Tolerance loosened vs. the all-f32 variant: the kernel feeds the MXU bf16
    # operands (single-pass matmuls) while gate math / state stay f32.
    assert jnp.allclose(hs, ref, atol=5e-2, rtol=5e-2), (
        float(jnp.max(jnp.abs(hs - ref))))
    print("KERNEL_OK")
</pallas_src>

<mosaic_0001>
module attributes {stable_mosaic.version = 11 : i64} {
  func.func @_gru_seq_kernel(%arg0: i32, %arg1: memref<64x96xbf16, #tpu.memory_space<vmem>>, %arg2: memref<8x8x1xf32, #tpu.memory_space<vmem>>, %arg3: memref<8x96xf32, #tpu.memory_space<vmem>>, %arg4: memref<96x96xbf16, #tpu.memory_space<vmem>>, %arg5: memref<96x96xbf16, #tpu.memory_space<vmem>>, %arg6: memref<1x96xf32, #tpu.memory_space<vmem>>, %arg7: memref<8x32xf32, #tpu.memory_space<vmem>>, %arg8: memref<8x8x32xf32, #tpu.memory_space<vmem>>, %arg9: memref<64x96xf32, #tpu.memory_space<vmem>>) attributes {dimension_semantics = [#tpu.dimension_semantics<arbitrary>], iteration_bounds = array<i64: 1>, scalar_prefetch = 0 : i64, scratch_operands = 1 : i64, tpu.core_type = #tpu.core_type<tc>, window_params = [{pipeline_mode = #tpu.pipeline_mode<synchronous>, transform_indices = @transform_0, window_bounds = array<i64: 64, 96>}, {pipeline_mode = #tpu.pipeline_mode<synchronous>, transform_indices = @transform_1, window_bounds = array<i64: 8, 8, 1>}, {pipeline_mode = #tpu.pipeline_mode<synchronous>, transform_indices = @transform_2, window_bounds = array<i64: 8, 96>}, {pipeline_mode = #tpu.pipeline_mode<synchronous>, transform_indices = @transform_3, window_bounds = array<i64: 96, 96>}, {pipeline_mode = #tpu.pipeline_mode<synchronous>, transform_indices = @transform_4, window_bounds = array<i64: 96, 96>}, {pipeline_mode = #tpu.pipeline_mode<synchronous>, transform_indices = @transform_5, window_bounds = array<i64: 1, 96>}, {pipeline_mode = #tpu.pipeline_mode<synchronous>, transform_indices = @transform_6, window_bounds = array<i64: 8, 32>}, {pipeline_mode = #tpu.pipeline_mode<synchronous>, transform_indices = @transform_7, window_bounds = array<i64: 8, 8, 32>}]} {
    %c0 = arith.constant 0 : index
    %c0_0 = arith.constant 0 : index
    %0 = vector.load %arg1[%c0, %c0_0] : memref<64x96xbf16, #tpu.memory_space<vmem>>, vector<64x96xbf16>
    %c0_1 = arith.constant 0 : index
    %c0_2 = arith.constant 0 : index
    %1 = vector.load %arg4[%c0_1, %c0_2] : memref<96x96xbf16, #tpu.memory_space<vmem>>, vector<96x96xbf16>
    %cst = arith.constant dense<0.000000e+00> : vector<64x96xf32>
    %2 = tpu.matmul %0, %1, %cst {dimension_numbers = #tpu.dot_dimension_numbers<[1], [0], [0], [1], [0, 0, 1, 1], [], []>} : vector<64x96xbf16>, vector<96x96xbf16>, vector<64x96xf32> -> vector<64x96xf32>
    %c0_3 = arith.constant 0 : index
    %c0_4 = arith.constant 0 : index
    %3 = vector.load %arg6[%c0_3, %c0_4] : memref<1x96xf32, #tpu.memory_space<vmem>>, vector<1x96xf32>
    %4 = vector.broadcast %3 : vector<1x96xf32> to vector<64x96xf32>
    %5 = arith.addf %2, %4 : vector<64x96xf32>
    %c0_5 = arith.constant 0 : index
    %c0_6 = arith.constant 0 : index
    %6 = vector.load %arg9[%c0_5, %c0_6] : memref<64x96xf32, #tpu.memory_space<vmem>>, vector<64x96xf32>
    tpu.vector_store %arg9[%c0_5, %c0_6], %5 {strides = array<i32>} : memref<64x96xf32, #tpu.memory_space<vmem>>, vector<64x96xf32>,
    %c0_7 = arith.constant 0 : index
    %c0_8 = arith.constant 0 : index
    %7 = vector.load %arg3[%c0_7, %c0_8] : memref<8x96xf32, #tpu.memory_space<vmem>>, vector<8x96xf32>
    %c0_9 = arith.constant 0 : index
    %c0_10 = arith.constant 0 : index
    %8 = vector.load %arg5[%c0_9, %c0_10] : memref<96x96xbf16, #tpu.memory_space<vmem>>, vector<96x96xbf16>
    %c0_11 = arith.constant 0 : index
    %c0_12 = arith.constant 0 : index
    %9 = vector.load %arg7[%c0_11, %c0_12] : memref<8x32xf32, #tpu.memory_space<vmem>>, vector<8x32xf32>
    %c0_i32 = arith.constant 0 : i32
    %10 = arith.index_cast %c0_i32 : i32 to index
    %c0_13 = arith.constant 0 : index
    %c0_14 = arith.constant 0 : index
    %11 = vector.load %arg2[%10, %c0_13, %c0_14] : memref<8x8x1xf32, #tpu.memory_space<vmem>>, vector<1x8x1xf32>
    %12 = vector.shape_cast %11 : vector<1x8x1xf32> to vector<8x1xf32>
    %c8_i32 = arith.constant 8 : i32
    %13 = arith.muli %c0_i32, %c8_i32 : i32
    %14 = tpu.assume_multiple %13, 8 : i32
    %15 = arith.index_cast %14 : i32 to index
    %c0_15 = arith.constant 0 : index
    %16 = vector.load %arg9[%15, %c0_15] : memref<64x96xf32, #tpu.memory_space<vmem>>, vector<8x96xf32>
    %17 = tpu.concatenate %9, %9, %9 in 1 : vector<8x32xf32>, vector<8x32xf32>, vector<8x32xf32> -> vector<8x96xf32>
    %18 = arith.mulf %17, %7 : vector<8x96xf32>
    %19 = arith.truncf %18 : vector<8x96xf32> to vector<8x96xbf16>
    %cst_16 = arith.constant dense<0.000000e+00> : vector<8x96xf32>
    %20 = tpu.matmul %19, %8, %cst_16 {dimension_numbers = #tpu.dot_dimension_numbers<[1], [0], [0], [1], [0, 0, 1, 1], [], []>} : vector<8x96xbf16>, vector<96x96xbf16>, vector<8x96xf32> -> vector<8x96xf32>
    %21 = vector.extract_strided_slice %16 {offsets = [0, 0], sizes = [8, 32], strides = [1, 1]} : vector<8x96xf32> to vector<8x32xf32>
    %22 = vector.extract_strided_slice %20 {offsets = [0, 0], sizes = [8, 32], strides = [1, 1]} : vector<8x96xf32> to vector<8x32xf32>
    %23 = arith.addf %21, %22 : vector<8x32xf32>
    %24 = arith.negf %23 : vector<8x32xf32>
    %25 = math.exp %24 : vector<8x32xf32>
    %cst_17 = arith.constant 1.000000e+00 : f32
    %26 = vector.broadcast %cst_17 : f32 to vector<8x32xf32>
    %27 = arith.addf %26, %25 : vector<8x32xf32>
    %28 = arith.divf %26, %27 : vector<8x32xf32>
    %29 = vector.extract_strided_slice %16 {offsets = [0, 32], sizes = [8, 32], strides = [1, 1]} : vector<8x96xf32> to vector<8x32xf32>
    %30 = vector.extract_strided_slice %20 {offsets = [0, 32], sizes = [8, 32], strides = [1, 1]} : vector<8x96xf32> to vector<8x32xf32>
    %31 = arith.addf %29, %30 : vector<8x32xf32>
    %32 = arith.negf %31 : vector<8x32xf32>
    %33 = math.exp %32 : vector<8x32xf32>
    %cst_18 = arith.constant 1.000000e+00 : f32
    %34 = vector.broadcast %cst_18 : f32 to vector<8x32xf32>
    %35 = arith.addf %34, %33 : vector<8x32xf32>
    %36 = arith.divf %34, %35 : vector<8x32xf32>
    %37 = vector.extract_strided_slice %16 {offsets = [0, 64], sizes = [8, 32], strides = [1, 1]} : vector<8x96xf32> to vector<8x32xf32>
    %38 = vector.extract_strided_slice %20 {offsets = [0, 64], sizes = [8, 32], strides = [1, 1]} : vector<8x96xf32> to vector<8x32xf32>
    %39 = arith.mulf %28, %38 : vector<8x32xf32>
    %40 = arith.addf %37, %39 : vector<8x32xf32>
    %41 = math.tanh %40 : vector<8x32xf32>
    %42 = arith.subf %9, %41 : vector<8x32xf32>
    %43 = arith.mulf %36, %42 : vector<8x32xf32>
    %44 = arith.addf %41, %43 : vector<8x32xf32>
    %45 = arith.subf %44, %9 : vector<8x32xf32>
    %46 = vector.broadcast %12 : vector<8x1xf32> to vector<8x32xf32>
    %47 = arith.mulf %46, %45 : vector<8x32xf32>
    %48 = arith.addf %9, %47 : vector<8x32xf32>
    %49 = arith.index_cast %c0_i32 : i32 to index
    %c0_19 = arith.constant 0 : index
    %c0_20 = arith.constant 0 : index
    %50 = vector.load %arg8[%49, %c0_19, %c0_20] : memref<8x8x32xf32, #tpu.memory_space<vmem>>, vector<1x8x32xf32>
    %51 = vector.shape_cast %50 : vector<1x8x32xf32> to vector<8x32xf32>
    %52 = vector.shape_cast %48 : vector<8x32xf32> to vector<1x8x32xf32>
    tpu.vector_store %arg8[%49, %c0_19, %c0_20], %52 {strides = array<i32>} : memref<8x8x32xf32, #tpu.memory_space<vmem>>, vector<1x8x32xf32>,
    %c1_i32 = arith.constant 1 : i32
    %53 = arith.index_cast %c1_i32 : i32 to index
    %c0_21 = arith.constant 0 : index
    %c0_22 = arith.constant 0 : index
    %54 = vector.load %arg2[%53, %c0_21, %c0_22] : memref<8x8x1xf32, #tpu.memory_space<vmem>>, vector<1x8x1xf32>
    %55 = vector.shape_cast %54 : vector<1x8x1xf32> to vector<8x1xf32>
    %c8_i32_23 = arith.constant 8 : i32
    %56 = arith.muli %c1_i32, %c8_i32_23 : i32
    %57 = tpu.assume_multiple %56, 8 : i32
    %58 = arith.index_cast %57 : i32 to index
    %c0_24 = arith.constant 0 : index
    %59 = vector.load %arg9[%58, %c0_24] : memref<64x96xf32, #tpu.memory_space<vmem>>, vector<8x96xf32>
    %60 = tpu.concatenate %48, %48, %48 in 1 : vector<8x32xf32>, vector<8x32xf32>, vector<8x32xf32> -> vector<8x96xf32>
    %61 = arith.mulf %60, %7 : vector<8x96xf32>
    %62 = arith.truncf %61 : vector<8x96xf32> to vector<8x96xbf16>
    %cst_25 = arith.constant dense<0.000000e+00> : vector<8x96xf32>
    %63 = tpu.matmul %62, %8, %cst_25 {dimension_numbers = #tpu.dot_dimension_numbers<[1], [0], [0], [1], [0, 0, 1, 1], [], []>} : vector<8x96xbf16>, vector<96x96xbf16>, vector<8x96xf32> -> vector<8x96xf32>
    %64 = vector.extract_strided_slice %59 {offsets = [0, 0], sizes = [8, 32], strides = [1, 1]} : vector<8x96xf32> to vector<8x32xf32>
    %65 = vector.extract_strided_slice %63 {offsets = [0, 0], sizes = [8, 32], strides = [1, 1]} : vector<8x96xf32> to vector<8x32xf32>
    %66 = arith.addf %64, %65 : vector<8x32xf32>
    %67 = arith.negf %66 : vector<8x32xf32>
    %68 = math.exp %67 : vector<8x32xf32>
    %cst_26 = arith.constant 1.000000e+00 : f32
    %69 = vector.broadcast %cst_26 : f32 to vector<8x32xf32>
    %70 = arith.addf %69, %68 : vector<8x32xf32>
    %71 = arith.divf %69, %70 : vector<8x32xf32>
    %72 = vector.extract_strided_slice %59 {offsets = [0, 32], sizes = [8, 32], strides = [1, 1]} : vector<8x96xf32> to vector<8x32xf32>
    %73 = vector.extract_strided_slice %63 {offsets = [0, 32], sizes = [8, 32], strides = [1, 1]} : vector<8x96xf32> to vector<8x32xf32>
    %74 = arith.addf %72, %73 : vector<8x32xf32>
    %75 = arith.negf %74 : vector<8x32xf32>
    %76 = math.exp %75 : vector<8x32xf32>
    %cst_27 = arith.constant 1.000000e+00 : f32
    %77 = vector.broadcast %cst_27 : f32 to vector<8x32xf32>
    %78 = arith.addf %77, %76 : vector<8x32xf32>
    %79 = arith.divf %77, %78 : vector<8x32xf32>
    %80 = vector.extract_strided_slice %59 {offsets = [0, 64], sizes = [8, 32], strides = [1, 1]} : vector<8x96xf32> to vector<8x32xf32>
    %81 = vector.extract_strided_slice %63 {offsets = [0, 64], sizes = [8, 32], strides = [1, 1]} : vector<8x96xf32> to vector<8x32xf32>
    %82 = arith.mulf %71, %81 : vector<8x32xf32>
    %83 = arith.addf %80, %82 : vector<8x32xf32>
    %84 = math.tanh %83 : vector<8x32xf32>
    %85 = arith.subf %48, %84 : vector<8x32xf32>
    %86 = arith.mulf %79, %85 : vector<8x32xf32>
    %87 = arith.addf %84, %86 : vector<8x32xf32>
    %88 = arith.subf %87, %48 : vector<8x32xf32>
    %89 = vector.broadcast %55 : vector<8x1xf32> to vector<8x32xf32>
    %90 = arith.mulf %89, %88 : vector<8x32xf32>
    %91 = arith.addf %48, %90 : vector<8x32xf32>
    %92 = arith.index_cast %c1_i32 : i32 to index
    %c0_28 = arith.constant 0 : index
    %c0_29 = arith.constant 0 : index
    %93 = vector.load %arg8[%92, %c0_28, %c0_29] : memref<8x8x32xf32, #tpu.memory_space<vmem>>, vector<1x8x32xf32>
    %94 = vector.shape_cast %93 : vector<1x8x32xf32> to vector<8x32xf32>
    %95 = vector.shape_cast %91 : vector<8x32xf32> to vector<1x8x32xf32>
    tpu.vector_store %arg8[%92, %c0_28, %c0_29], %95 {strides = array<i32>} : memref<8x8x32xf32, #tpu.memory_space<vmem>>, vector<1x8x32xf32>,
    %c2_i32 = arith.constant 2 : i32
    %96 = arith.index_cast %c2_i32 : i32 to index
    %c0_30 = arith.constant 0 : index
    %c0_31 = arith.constant 0 : index
    %97 = vector.load %arg2[%96, %c0_30, %c0_31] : memref<8x8x1xf32, #tpu.memory_space<vmem>>, vector<1x8x1xf32>
    %98 = vector.shape_cast %97 : vector<1x8x1xf32> to vector<8x1xf32>
    %c8_i32_32 = arith.constant 8 : i32
    %99 = arith.muli %c2_i32, %c8_i32_32 : i32
    %100 = tpu.assume_multiple %99, 8 : i32
    %101 = arith.index_cast %100 : i32 to index
    %c0_33 = arith.constant 0 : index
    %102 = vector.load %arg9[%101, %c0_33] : memref<64x96xf32, #tpu.memory_space<vmem>>, vector<8x96xf32>
    %103 = tpu.concatenate %91, %91, %91 in 1 : vector<8x32xf32>, vector<8x32xf32>, vector<8x32xf32> -> vector<8x96xf32>
    %104 = arith.mulf %103, %7 : vector<8x96xf32>
    %105 = arith.truncf %104 : vector<8x96xf32> to vector<8x96xbf16>
    %cst_34 = arith.constant dense<0.000000e+00> : vector<8x96xf32>
    %106 = tpu.matmul %105, %8, %cst_34 {dimension_numbers = #tpu.dot_dimension_numbers<[1], [0], [0], [1], [0, 0, 1, 1], [], []>} : vector<8x96xbf16>, vector<96x96xbf16>, vector<8x96xf32> -> vector<8x96xf32>
    %107 = vector.extract_strided_slice %102 {offsets = [0, 0], sizes = [8, 32], strides = [1, 1]} : vector<8x96xf32> to vector<8x32xf32>
    %108 = vector.extract_strided_slice %106 {offsets = [0, 0], sizes = [8, 32], strides = [1, 1]} : vector<8x96xf32> to vector<8x32xf32>
    %109 = arith.addf %107, %108 : vector<8x32xf32>
    %110 = arith.negf %109 : vector<8x32xf32>
    %111 = math.exp %110 : vector<8x32xf32>
    %cst_35 = arith.constant 1.000000e+00 : f32
    %112 = vector.broadcast %cst_35 : f32 to vector<8x32xf32>
    %113 = arith.addf %112, %111 : vector<8x32xf32>
    %114 = arith.divf %112, %113 : vector<8x32xf32>
    %115 = vector.extract_strided_slice %102 {offsets = [0, 32], sizes = [8, 32], strides = [1, 1]} : vector<8x96xf32> to vector<8x32xf32>
    %116 = vector.extract_strided_slice %106 {offsets = [0, 32], sizes = [8, 32], strides = [1, 1]} : vector<8x96xf32> to vector<8x32xf32>
    %117 = arith.addf %115, %116 : vector<8x32xf32>
    %118 = arith.negf %117 : vector<8x32xf32>
    %119 = math.exp %118 : vector<8x32xf32>
    %cst_36 = arith.constant 1.000000e+00 : f32
    %120 = vector.broadcast %cst_36 : f32 to vector<8x32xf32>
    %121 = arith.addf %120, %119 : vector<8x32xf32>
    %122 = arith.divf %120, %121 : vector<8x32xf32>
    %123 = vector.extract_strided_slice %102 {offsets = [0, 64], sizes = [8, 32], strides = [1, 1]} : vector<8x96xf32> to vector<8x32xf32>
    %124 = vector.extract_strided_slice %106 {offsets = [0, 64], sizes = [8, 32], strides = [1, 1]} : vector<8x96xf32> to vector<8x32xf32>
    %125 = arith.mulf %114, %124 : vector<8x32xf32>
    %126 = arith.addf %123, %125 : vector<8x32xf32>
    %127 = math.tanh %126 : vector<8x32xf32>
    %128 = arith.subf %91, %127 : vector<8x32xf32>
    %129 = arith.mulf %122, %128 : vector<8x32xf32>
    %130 = arith.addf %127, %129 : vector<8x32xf32>
    %131 = arith.subf %130, %91 : vector<8x32xf32>
    %132 = vector.broadcast %98 : vector<8x1xf32> to vector<8x32xf32>
    %133 = arith.mulf %132, %131 : vector<8x32xf32>
    %134 = arith.addf %91, %133 : vector<8x32xf32>
    %135 = arith.index_cast %c2_i32 : i32 to index
    %c0_37 = arith.constant 0 : index
    %c0_38 = arith.constant 0 : index
    %136 = vector.load %arg8[%135, %c0_37, %c0_38] : memref<8x8x32xf32, #tpu.memory_space<vmem>>, vector<1x8x32xf32>
    %137 = vector.shape_cast %136 : vector<1x8x32xf32> to vector<8x32xf32>
    %138 = vector.shape_cast %134 : vector<8x32xf32> to vector<1x8x32xf32>
    tpu.vector_store %arg8[%135, %c0_37, %c0_38], %138 {strides = array<i32>} : memref<8x8x32xf32, #tpu.memory_space<vmem>>, vector<1x8x32xf32>,
    %c3_i32 = arith.constant 3 : i32
    %139 = arith.index_cast %c3_i32 : i32 to index
    %c0_39 = arith.constant 0 : index
    %c0_40 = arith.constant 0 : index
    %140 = vector.load %arg2[%139, %c0_39, %c0_40] : memref<8x8x1xf32, #tpu.memory_space<vmem>>, vector<1x8x1xf32>
    %141 = vector.shape_cast %140 : vector<1x8x1xf32> to vector<8x1xf32>
    %c8_i32_41 = arith.constant 8 : i32
    %142 = arith.muli %c3_i32, %c8_i32_41 : i32
    %143 = tpu.assume_multiple %142, 8 : i32
    %144 = arith.index_cast %143 : i32 to index
    %c0_42 = arith.constant 0 : index
    %145 = vector.load %arg9[%144, %c0_42] : memref<64x96xf32, #tpu.memory_space<vmem>>, vector<8x96xf32>
    %146 = tpu.concatenate %134, %134, %134 in 1 : vector<8x32xf32>, vector<8x32xf32>, vector<8x32xf32> -> vector<8x96xf32>
    %147 = arith.mulf %146, %7 : vector<8x96xf32>
    %148 = arith.truncf %147 : vector<8x96xf32> to vector<8x96xbf16>
    %cst_43 = arith.constant dense<0.000000e+00> : vector<8x96xf32>
    %149 = tpu.matmul %148, %8, %cst_43 {dimension_numbers = #tpu.dot_dimension_numbers<[1], [0], [0], [1], [0, 0, 1, 1], [], []>} : vector<8x96xbf16>, vector<96x96xbf16>, vector<8x96xf32> -> vector<8x96xf32>
    %150 = vector.extract_strided_slice %145 {offsets = [0, 0], sizes = [8, 32], strides = [1, 1]} : vector<8x96xf32> to vector<8x32xf32>
    %151 = vector.extract_strided_slice %149 {offsets = [0, 0], sizes = [8, 32], strides = [1, 1]} : vector<8x96xf32> to vector<8x32xf32>
    %152 = arith.addf %150, %151 : vector<8x32xf32>
    %153 = arith.negf %152 : vector<8x32xf32>
    %154 = math.exp %153 : vector<8x32xf32>
    %cst_44 = arith.constant 1.000000e+00 : f32
    %155 = vector.broadcast %cst_44 : f32 to vector<8x32xf32>
    %156 = arith.addf %155, %154 : vector<8x32xf32>
    %157 = arith.divf %155, %156 : vector<8x32xf32>
    %158 = vector.extract_strided_slice %145 {offsets = [0, 32], sizes = [8, 32], strides = [1, 1]} : vector<8x96xf32> to vector<8x32xf32>
    %159 = vector.extract_strided_slice %149 {offsets = [0, 32], sizes = [8, 32], strides = [1, 1]} : vector<8x96xf32> to vector<8x32xf32>
    %160 = arith.addf %158, %159 : vector<8x32xf32>
    %161 = arith.negf %160 : vector<8x32xf32>
    %162 = math.exp %161 : vector<8x32xf32>
    %cst_45 = arith.constant 1.000000e+00 : f32
    %163 = vector.broadcast %cst_45 : f32 to vector<8x32xf32>
    %164 = arith.addf %163, %162 : vector<8x32xf32>
    %165 = arith.divf %163, %164 : vector<8x32xf32>
    %166 = vector.extract_strided_slice %145 {offsets = [0, 64], sizes = [8, 32], strides = [1, 1]} : vector<8x96xf32> to vector<8x32xf32>
    %167 = vector.extract_strided_slice %149 {offsets = [0, 64], sizes = [8, 32], strides = [1, 1]} : vector<8x96xf32> to vector<8x32xf32>
    %168 = arith.mulf %157, %167 : vector<8x32xf32>
    %169 = arith.addf %166, %168 : vector<8x32xf32>
    %170 = math.tanh %169 : vector<8x32xf32>
    %171 = arith.subf %134, %170 : vector<8x32xf32>
    %172 = arith.mulf %165, %171 : vector<8x32xf32>
    %173 = arith.addf %170, %172 : vector<8x32xf32>
    %174 = arith.subf %173, %134 : vector<8x32xf32>
    %175 = vector.broadcast %141 : vector<8x1xf32> to vector<8x32xf32>
    %176 = arith.mulf %175, %174 : vector<8x32xf32>
    %177 = arith.addf %134, %176 : vector<8x32xf32>
    %178 = arith.index_cast %c3_i32 : i32 to index
    %c0_46 = arith.constant 0 : index
    %c0_47 = arith.constant 0 : index
    %179 = vector.load %arg8[%178, %c0_46, %c0_47] : memref<8x8x32xf32, #tpu.memory_space<vmem>>, vector<1x8x32xf32>
    %180 = vector.shape_cast %179 : vector<1x8x32xf32> to vector<8x32xf32>
    %181 = vector.shape_cast %177 : vector<8x32xf32> to vector<1x8x32xf32>
    tpu.vector_store %arg8[%178, %c0_46, %c0_47], %181 {strides = array<i32>} : memref<8x8x32xf32, #tpu.memory_space<vmem>>, vector<1x8x32xf32>,
    %c4_i32 = arith.constant 4 : i32
    %182 = arith.index_cast %c4_i32 : i32 to index
    %c0_48 = arith.constant 0 : index
    %c0_49 = arith.constant 0 : index
    %183 = vector.load %arg2[%182, %c0_48, %c0_49] : memref<8x8x1xf32, #tpu.memory_space<vmem>>, vector<1x8x1xf32>
    %184 = vector.shape_cast %183 : vector<1x8x1xf32> to vector<8x1xf32>
    %c8_i32_50 = arith.constant 8 : i32
    %185 = arith.muli %c4_i32, %c8_i32_50 : i32
    %186 = tpu.assume_multiple %185, 8 : i32
    %187 = arith.index_cast %186 : i32 to index
    %c0_51 = arith.constant 0 : index
    %188 = vector.load %arg9[%187, %c0_51] : memref<64x96xf32, #tpu.memory_space<vmem>>, vector<8x96xf32>
    %189 = tpu.concatenate %177, %177, %177 in 1 : vector<8x32xf32>, vector<8x32xf32>, vector<8x32xf32> -> vector<8x96xf32>
    %190 = arith.mulf %189, %7 : vector<8x96xf32>
    %191 = arith.truncf %190 : vector<8x96xf32> to vector<8x96xbf16>
    %cst_52 = arith.constant dense<0.000000e+00> : vector<8x96xf32>
    %192 = tpu.matmul %191, %8, %cst_52 {dimension_numbers = #tpu.dot_dimension_numbers<[1], [0], [0], [1], [0, 0, 1, 1], [], []>} : vector<8x96xbf16>, vector<96x96xbf16>, vector<8x96xf32> -> vector<8x96xf32>
    %193 = vector.extract_strided_slice %188 {offsets = [0, 0], sizes = [8, 32], strides = [1, 1]} : vector<8x96xf32> to vector<8x32xf32>
    %194 = vector.extract_strided_slice %192 {offsets = [0, 0], sizes = [8, 32], strides = [1, 1]} : vector<8x96xf32> to vector<8x32xf32>
    %195 = arith.addf %193, %194 : vector<8x32xf32>
    %196 = arith.negf %195 : vector<8x32xf32>
    %197 = math.exp %196 : vector<8x32xf32>
    %cst_53 = arith.constant 1.000000e+00 : f32
    %198 = vector.broadcast %cst_53 : f32 to vector<8x32xf32>
    %199 = arith.addf %198, %197 : vector<8x32xf32>
    %200 = arith.divf %198, %199 : vector<8x32xf32>
    %201 = vector.extract_strided_slice %188 {offsets = [0, 32], sizes = [8, 32], strides = [1, 1]} : vector<8x96xf32> to vector<8x32xf32>
    %202 = vector.extract_strided_slice %192 {offsets = [0, 32], sizes = [8, 32], strides = [1, 1]} : vector<8x96xf32> to vector<8x32xf32>
    %203 = arith.addf %201, %202 : vector<8x32xf32>
    %204 = arith.negf %203 : vector<8x32xf32>
    %205 = math.exp %204 : vector<8x32xf32>
    %cst_54 = arith.constant 1.000000e+00 : f32
    %206 = vector.broadcast %cst_54 : f32 to vector<8x32xf32>
    %207 = arith.addf %206, %205 : vector<8x32xf32>
    %208 = arith.divf %206, %207 : vector<8x32xf32>
    %209 = vector.extract_strided_slice %188 {offsets = [0, 64], sizes = [8, 32], strides = [1, 1]} : vector<8x96xf32> to vector<8x32xf32>
    %210 = vector.extract_strided_slice %192 {offsets = [0, 64], sizes = [8, 32], strides = [1, 1]} : vector<8x96xf32> to vector<8x32xf32>
    %211 = arith.mulf %200, %210 : vector<8x32xf32>
    %212 = arith.addf %209, %211 : vector<8x32xf32>
    %213 = math.tanh %212 : vector<8x32xf32>
    %214 = arith.subf %177, %213 : vector<8x32xf32>
    %215 = arith.mulf %208, %214 : vector<8x32xf32>
    %216 = arith.addf %213, %215 : vector<8x32xf32>
    %217 = arith.subf %216, %177 : vector<8x32xf32>
    %218 = vector.broadcast %184 : vector<8x1xf32> to vector<8x32xf32>
    %219 = arith.mulf %218, %217 : vector<8x32xf32>
    %220 = arith.addf %177, %219 : vector<8x32xf32>
    %221 = arith.index_cast %c4_i32 : i32 to index
    %c0_55 = arith.constant 0 : index
    %c0_56 = arith.constant 0 : index
    %222 = vector.load %arg8[%221, %c0_55, %c0_56] : memref<8x8x32xf32, #tpu.memory_space<vmem>>, vector<1x8x32xf32>
    %223 = vector.shape_cast %222 : vector<1x8x32xf32> to vector<8x32xf32>
    %224 = vector.shape_cast %220 : vector<8x32xf32> to vector<1x8x32xf32>
    tpu.vector_store %arg8[%221, %c0_55, %c0_56], %224 {strides = array<i32>} : memref<8x8x32xf32, #tpu.memory_space<vmem>>, vector<1x8x32xf32>,
    %c5_i32 = arith.constant 5 : i32
    %225 = arith.index_cast %c5_i32 : i32 to index
    %c0_57 = arith.constant 0 : index
    %c0_58 = arith.constant 0 : index
    %226 = vector.load %arg2[%225, %c0_57, %c0_58] : memref<8x8x1xf32, #tpu.memory_space<vmem>>, vector<1x8x1xf32>
    %227 = vector.shape_cast %226 : vector<1x8x1xf32> to vector<8x1xf32>
    %c8_i32_59 = arith.constant 8 : i32
    %228 = arith.muli %c5_i32, %c8_i32_59 : i32
    %229 = tpu.assume_multiple %228, 8 : i32
    %230 = arith.index_cast %229 : i32 to index
    %c0_60 = arith.constant 0 : index
    %231 = vector.load %arg9[%230, %c0_60] : memref<64x96xf32, #tpu.memory_space<vmem>>, vector<8x96xf32>
    %232 = tpu.concatenate %220, %220, %220 in 1 : vector<8x32xf32>, vector<8x32xf32>, vector<8x32xf32> -> vector<8x96xf32>
    %233 = arith.mulf %232, %7 : vector<8x96xf32>
    %234 = arith.truncf %233 : vector<8x96xf32> to vector<8x96xbf16>
    %cst_61 = arith.constant dense<0.000000e+00> : vector<8x96xf32>
    %235 = tpu.matmul %234, %8, %cst_61 {dimension_numbers = #tpu.dot_dimension_numbers<[1], [0], [0], [1], [0, 0, 1, 1], [], []>} : vector<8x96xbf16>, vector<96x96xbf16>, vector<8x96xf32> -> vector<8x96xf32>
    %236 = vector.extract_strided_slice %231 {offsets = [0, 0], sizes = [8, 32], strides = [1, 1]} : vector<8x96xf32> to vector<8x32xf32>
    %237 = vector.extract_strided_slice %235 {offsets = [0, 0], sizes = [8, 32], strides = [1, 1]} : vector<8x96xf32> to vector<8x32xf32>
    %238 = arith.addf %236, %237 : vector<8x32xf32>
    %239 = arith.negf %238 : vector<8x32xf32>
    %240 = math.exp %239 : vector<8x32xf32>
    %cst_62 = arith.constant 1.000000e+00 : f32
    %241 = vector.broadcast %cst_62 : f32 to vector<8x32xf32>
    %242 = arith.addf %241, %240 : vector<8x32xf32>
    %243 = arith.divf %241, %242 : vector<8x32xf32>
    %244 = vector.extract_strided_slice %231 {offsets = [0, 32], sizes = [8, 32], strides = [1, 1]} : vector<8x96xf32> to vector<8x32xf32>
    %245 = vector.extract_strided_slice %235 {offsets = [0, 32], sizes = [8, 32], strides = [1, 1]} : vector<8x96xf32> to vector<8x32xf32>
    %246 = arith.addf %244, %245 : vector<8x32xf32>
    %247 = arith.negf %246 : vector<8x32xf32>
    %248 = math.exp %247 : vector<8x32xf32>
    %cst_63 = arith.constant 1.000000e+00 : f32
    %249 = vector.broadcast %cst_63 : f32 to vector<8x32xf32>
    %250 = arith.addf %249, %248 : vector<8x32xf32>
    %251 = arith.divf %249, %250 : vector<8x32xf32>
    %252 = vector.extract_strided_slice %231 {offsets = [0, 64], sizes = [8, 32], strides = [1, 1]} : vector<8x96xf32> to vector<8x32xf32>
    %253 = vector.extract_strided_slice %235 {offsets = [0, 64], sizes = [8, 32], strides = [1, 1]} : vector<8x96xf32> to vector<8x32xf32>
    %254 = arith.mulf %243, %253 : vector<8x32xf32>
    %255 = arith.addf %252, %254 : vector<8x32xf32>
    %256 = math.tanh %255 : vector<8x32xf32>
    %257 = arith.subf %220, %256 : vector<8x32xf32>
    %258 = arith.mulf %251, %257 : vector<8x32xf32>
    %259 = arith.addf %256, %258 : vector<8x32xf32>
    %260 = arith.subf %259, %220 : vector<8x32xf32>
    %261 = vector.broadcast %227 : vector<8x1xf32> to vector<8x32xf32>
    %262 = arith.mulf %261, %260 : vector<8x32xf32>
    %263 = arith.addf %220, %262 : vector<8x32xf32>
    %264 = arith.index_cast %c5_i32 : i32 to index
    %c0_64 = arith.constant 0 : index
    %c0_65 = arith.constant 0 : index
    %265 = vector.load %arg8[%264, %c0_64, %c0_65] : memref<8x8x32xf32, #tpu.memory_space<vmem>>, vector<1x8x32xf32>
    %266 = vector.shape_cast %265 : vector<1x8x32xf32> to vector<8x32xf32>
    %267 = vector.shape_cast %263 : vector<8x32xf32> to vector<1x8x32xf32>
    tpu.vector_store %arg8[%264, %c0_64, %c0_65], %267 {strides = array<i32>} : memref<8x8x32xf32, #tpu.memory_space<vmem>>, vector<1x8x32xf32>,
    %c6_i32 = arith.constant 6 : i32
    %268 = arith.index_cast %c6_i32 : i32 to index
    %c0_66 = arith.constant 0 : index
    %c0_67 = arith.constant 0 : index
    %269 = vector.load %arg2[%268, %c0_66, %c0_67] : memref<8x8x1xf32, #tpu.memory_space<vmem>>, vector<1x8x1xf32>
    %270 = vector.shape_cast %269 : vector<1x8x1xf32> to vector<8x1xf32>
    %c8_i32_68 = arith.constant 8 : i32
    %271 = arith.muli %c6_i32, %c8_i32_68 : i32
    %272 = tpu.assume_multiple %271, 8 : i32
    %273 = arith.index_cast %272 : i32 to index
    %c0_69 = arith.constant 0 : index
    %274 = vector.load %arg9[%273, %c0_69] : memref<64x96xf32, #tpu.memory_space<vmem>>, vector<8x96xf32>
    %275 = tpu.concatenate %263, %263, %263 in 1 : vector<8x32xf32>, vector<8x32xf32>, vector<8x32xf32> -> vector<8x96xf32>
    %276 = arith.mulf %275, %7 : vector<8x96xf32>
    %277 = arith.truncf %276 : vector<8x96xf32> to vector<8x96xbf16>
    %cst_70 = arith.constant dense<0.000000e+00> : vector<8x96xf32>
    %278 = tpu.matmul %277, %8, %cst_70 {dimension_numbers = #tpu.dot_dimension_numbers<[1], [0], [0], [1], [0, 0, 1, 1], [], []>} : vector<8x96xbf16>, vector<96x96xbf16>, vector<8x96xf32> -> vector<8x96xf32>
    %279 = vector.extract_strided_slice %274 {offsets = [0, 0], sizes = [8, 32], strides = [1, 1]} : vector<8x96xf32> to vector<8x32xf32>
    %280 = vector.extract_strided_slice %278 {offsets = [0, 0], sizes = [8, 32], strides = [1, 1]} : vector<8x96xf32> to vector<8x32xf32>
    %281 = arith.addf %279, %280 : vector<8x32xf32>
    %282 = arith.negf %281 : vector<8x32xf32>
    %283 = math.exp %282 : vector<8x32xf32>
    %cst_71 = arith.constant 1.000000e+00 : f32
    %284 = vector.broadcast %cst_71 : f32 to vector<8x32xf32>
    %285 = arith.addf %284, %283 : vector<8x32xf32>
    %286 = arith.divf %284, %285 : vector<8x32xf32>
    %287 = vector.extract_strided_slice %274 {offsets = [0, 32], sizes = [8, 32], strides = [1, 1]} : vector<8x96xf32> to vector<8x32xf32>
    %288 = vector.extract_strided_slice %278 {offsets = [0, 32], sizes = [8, 32], strides = [1, 1]} : vector<8x96xf32> to vector<8x32xf32>
    %289 = arith.addf %287, %288 : vector<8x32xf32>
    %290 = arith.negf %289 : vector<8x32xf32>
    %291 = math.exp %290 : vector<8x32xf32>
    %cst_72 = arith.constant 1.000000e+00 : f32
    %292 = vector.broadcast %cst_72 : f32 to vector<8x32xf32>
    %293 = arith.addf %292, %291 : vector<8x32xf32>
    %294 = arith.divf %292, %293 : vector<8x32xf32>
    %295 = vector.extract_strided_slice %274 {offsets = [0, 64], sizes = [8, 32], strides = [1, 1]} : vector<8x96xf32> to vector<8x32xf32>
    %296 = vector.extract_strided_slice %278 {offsets = [0, 64], sizes = [8, 32], strides = [1, 1]} : vector<8x96xf32> to vector<8x32xf32>
    %297 = arith.mulf %286, %296 : vector<8x32xf32>
    %298 = arith.addf %295, %297 : vector<8x32xf32>
    %299 = math.tanh %298 : vector<8x32xf32>
    %300 = arith.subf %263, %299 : vector<8x32xf32>
    %301 = arith.mulf %294, %300 : vector<8x32xf32>
    %302 = arith.addf %299, %301 : vector<8x32xf32>
    %303 = arith.subf %302, %263 : vector<8x32xf32>
    %304 = vector.broadcast %270 : vector<8x1xf32> to vector<8x32xf32>
    %305 = arith.mulf %304, %303 : vector<8x32xf32>
    %306 = arith.addf %263, %305 : vector<8x32xf32>
    %307 = arith.index_cast %c6_i32 : i32 to index
    %c0_73 = arith.constant 0 : index
    %c0_74 = arith.constant 0 : index
    %308 = vector.load %arg8[%307, %c0_73, %c0_74] : memref<8x8x32xf32, #tpu.memory_space<vmem>>, vector<1x8x32xf32>
    %309 = vector.shape_cast %308 : vector<1x8x32xf32> to vector<8x32xf32>
    %310 = vector.shape_cast %306 : vector<8x32xf32> to vector<1x8x32xf32>
    tpu.vector_store %arg8[%307, %c0_73, %c0_74], %310 {strides = array<i32>} : memref<8x8x32xf32, #tpu.memory_space<vmem>>, vector<1x8x32xf32>,
    %c7_i32 = arith.constant 7 : i32
    %311 = arith.index_cast %c7_i32 : i32 to index
    %c0_75 = arith.constant 0 : index
    %c0_76 = arith.constant 0 : index
    %312 = vector.load %arg2[%311, %c0_75, %c0_76] : memref<8x8x1xf32, #tpu.memory_space<vmem>>, vector<1x8x1xf32>
    %313 = vector.shape_cast %312 : vector<1x8x1xf32> to vector<8x1xf32>
    %c8_i32_77 = arith.constant 8 : i32
    %314 = arith.muli %c7_i32, %c8_i32_77 : i32
    %315 = tpu.assume_multiple %314, 8 : i32
    %316 = arith.index_cast %315 : i32 to index
    %c0_78 = arith.constant 0 : index
    %317 = vector.load %arg9[%316, %c0_78] : memref<64x96xf32, #tpu.memory_space<vmem>>, vector<8x96xf32>
    %318 = tpu.concatenate %306, %306, %306 in 1 : vector<8x32xf32>, vector<8x32xf32>, vector<8x32xf32> -> vector<8x96xf32>
    %319 = arith.mulf %318, %7 : vector<8x96xf32>
    %320 = arith.truncf %319 : vector<8x96xf32> to vector<8x96xbf16>
    %cst_79 = arith.constant dense<0.000000e+00> : vector<8x96xf32>
    %321 = tpu.matmul %320, %8, %cst_79 {dimension_numbers = #tpu.dot_dimension_numbers<[1], [0], [0], [1], [0, 0, 1, 1], [], []>} : vector<8x96xbf16>, vector<96x96xbf16>, vector<8x96xf32> -> vector<8x96xf32>
    %322 = vector.extract_strided_slice %317 {offsets = [0, 0], sizes = [8, 32], strides = [1, 1]} : vector<8x96xf32> to vector<8x32xf32>
    %323 = vector.extract_strided_slice %321 {offsets = [0, 0], sizes = [8, 32], strides = [1, 1]} : vector<8x96xf32> to vector<8x32xf32>
    %324 = arith.addf %322, %323 : vector<8x32xf32>
    %325 = arith.negf %324 : vector<8x32xf32>
    %326 = math.exp %325 : vector<8x32xf32>
    %cst_80 = arith.constant 1.000000e+00 : f32
    %327 = vector.broadcast %cst_80 : f32 to vector<8x32xf32>
    %328 = arith.addf %327, %326 : vector<8x32xf32>
    %329 = arith.divf %327, %328 : vector<8x32xf32>
    %330 = vector.extract_strided_slice %317 {offsets = [0, 32], sizes = [8, 32], strides = [1, 1]} : vector<8x96xf32> to vector<8x32xf32>
    %331 = vector.extract_strided_slice %321 {offsets = [0, 32], sizes = [8, 32], strides = [1, 1]} : vector<8x96xf32> to vector<8x32xf32>
    %332 = arith.addf %330, %331 : vector<8x32xf32>
    %333 = arith.negf %332 : vector<8x32xf32>
    %334 = math.exp %333 : vector<8x32xf32>
    %cst_81 = arith.constant 1.000000e+00 : f32
    %335 = vector.broadcast %cst_81 : f32 to vector<8x32xf32>
    %336 = arith.addf %335, %334 : vector<8x32xf32>
    %337 = arith.divf %335, %336 : vector<8x32xf32>
    %338 = vector.extract_strided_slice %317 {offsets = [0, 64], sizes = [8, 32], strides = [1, 1]} : vector<8x96xf32> to vector<8x32xf32>
    %339 = vector.extract_strided_slice %321 {offsets = [0, 64], sizes = [8, 32], strides = [1, 1]} : vector<8x96xf32> to vector<8x32xf32>
    %340 = arith.mulf %329, %339 : vector<8x32xf32>
    %341 = arith.addf %338, %340 : vector<8x32xf32>
    %342 = math.tanh %341 : vector<8x32xf32>
    %343 = arith.subf %306, %342 : vector<8x32xf32>
    %344 = arith.mulf %337, %343 : vector<8x32xf32>
    %345 = arith.addf %342, %344 : vector<8x32xf32>
    %346 = arith.subf %345, %306 : vector<8x32xf32>
    %347 = vector.broadcast %313 : vector<8x1xf32> to vector<8x32xf32>
    %348 = arith.mulf %347, %346 : vector<8x32xf32>
    %349 = arith.addf %306, %348 : vector<8x32xf32>
    %350 = arith.index_cast %c7_i32 : i32 to index
    %c0_82 = arith.constant 0 : index
    %c0_83 = arith.constant 0 : index
    %351 = vector.load %arg8[%350, %c0_82, %c0_83] : memref<8x8x32xf32, #tpu.memory_space<vmem>>, vector<1x8x32xf32>
    %352 = vector.shape_cast %351 : vector<1x8x32xf32> to vector<8x32xf32>
    %353 = vector.shape_cast %349 : vector<8x32xf32> to vector<1x8x32xf32>
    tpu.vector_store %arg8[%350, %c0_82, %c0_83], %353 {strides = array<i32>} : memref<8x8x32xf32, #tpu.memory_space<vmem>>, vector<1x8x32xf32>,
    %c8_i32_84 = arith.constant 8 : i32
    return
  }
  func.func @transform_0(%arg0: i32) -> (i32, i32) {
    %c0_i32 = arith.constant 0 : i32
    %c0_i32_0 = arith.constant 0 : i32
    %c0_i32_1 = arith.constant 0 : i32
    return %c0_i32, %c0_i32_0 : i32, i32
  }
  func.func @transform_1(%arg0: i32) -> (i32, i32, i32) {
    %c0_i32 = arith.constant 0 : i32
    %c0_i32_0 = arith.constant 0 : i32
    %c0_i32_1 = arith.constant 0 : i32
    %c0_i32_2 = arith.constant 0 : i32
    return %c0_i32, %c0_i32_0, %c0_i32_1 : i32, i32, i32
  }
  func.func @transform_2(%arg0: i32) -> (i32, i32) {
    %c0_i32 = arith.constant 0 : i32
    %c0_i32_0 = arith.constant 0 : i32
    %c0_i32_1 = arith.constant 0 : i32
    return %c0_i32, %c0_i32_0 : i32, i32
  }
  func.func @transform_3(%arg0: i32) -> (i32, i32) {
    %c0_i32 = arith.constant 0 : i32
    %c0_i32_0 = arith.constant 0 : i32
    %c0_i32_1 = arith.constant 0 : i32
    return %c0_i32, %c0_i32_0 : i32, i32
  }
  func.func @transform_4(%arg0: i32) -> (i32, i32) {
    %c0_i32 = arith.constant 0 : i32
    %c0_i32_0 = arith.constant 0 : i32
    %c0_i32_1 = arith.constant 0 : i32
    return %c0_i32, %c0_i32_0 : i32, i32
  }
  func.func @transform_5(%arg0: i32) -> (i32, i32) {
    %c0_i32 = arith.constant 0 : i32
    %c0_i32_0 = arith.constant 0 : i32
    %c0_i32_1 = arith.constant 0 : i32
    return %c0_i32, %c0_i32_0 : i32, i32
  }
  func.func @transform_6(%arg0: i32) -> (i32, i32) {
    %c0_i32 = arith.constant 0 : i32
    %c0_i32_0 = arith.constant 0 : i32
    %c0_i32_1 = arith.constant 0 : i32
    return %c0_i32, %c0_i32_0 : i32, i32
  }
  func.func @transform_7(%arg0: i32) -> (i32, i32, i32) {
    %c0_i32 = arith.constant 0 : i32
    %c0_i32_0 = arith.constant 0 : i32
    %c0_i32_1 = arith.constant 0 : i32
    %c0_i32_2 = arith.constant 0 : i32
    return %c0_i32, %c0_i32_0, %c0_i32_1 : i32, i32, i32
  }
}

</mosaic_0001>

<bundles_post_ra>
// kernel: tpu_custom_call.1
= control target key start
LH: loop header
LB: loop body
LE: loop exit
PB: predicated region body
PF: predicated region fallthrough
CT: control target
= control target key end

     0   :  { %12 = vsyncpa [#allocation4], 0  ;;  %s1964_s0 = inlined_call_operand.vmem [shape: bf16[64,96], index: 0, kind: input, shape index: {}]   ;;  %s1965_s1 = inlined_call_operand.vmem [shape: f32[8,8,1], index: 1, kind: input, shape index: {}]   ;;  %s1966_s2 = inlined_call_operand.hbm [shape: f32[8,96], index: 2, kind: input, shape index: {}]   ;;  %s1967_s3 = inlined_call_operand.vmem [shape: bf16[96,96], index: 3, kind: input, shape index: {}]   ;;  %s1968_s4 = inlined_call_operand.hbm [shape: bf16[96,96], index: 4, kind: input, shape index: {}]   ;;  %s1969_s5 = inlined_call_operand.vmem [shape: f32[1,96], index: 5, kind: input, shape index: {}]   ;;  %s1970_s6 = inlined_call_operand.vmem [shape: f32[8,32], index: 6, kind: input, shape index: {}]   ;;  %s1971_s7 = inlined_call_operand.hbm [shape: f32[8,8,32], index: 7, kind: output, shape index: {}]  }
   0x1   :  { %13 = vsyncpa [#allocation7], 0 }
   0x2   :  { %14 = vsyncpa [#allocation5], 0  ;;  %s1537_s24 = smov [#allocation3]   ;;  %s1538_s26 = smov [#allocation6]  }
   0x3   :  { %s25_s25 = sshll.u32 %s1537_s24, 4  ;;  %s36_s27 = sshll.u32 %s1538_s26, 4  ;;  %s26_s25 = int_to_ptr.vmem [resolvable:$true] %s25_s25  ;;  %s1588_s27 = int_to_ptr.vmem [resolvable:$true] %s36_s27 }
   0x4   :  { %s1465_s30 = scalar_lea.hbm %s1966_s2, 128 }
   0x5   :  { %p1466_p0 = scmp.ne.s32.totalorder %s1966_s2, %s1465_s30  ;;  %p1469_p1 = scmp.lt.u32.totalorder %s1465_s30, %s1966_s2 }
   0x7   :  { %p1471_p2 = pnand %p1469_p1, %p1466_p0 }
   0x9   :  { %1474 = shalt.err (!%p1471_p2)
}
   0xa   :  { %s1475_s12 = scalar_lea.vmem %s26_s25, 128  ;;  %p1480_p4 = scmp.lt.s32.totalorder %s26_s25, %s26_s25 }
   0xb   :  { %p1476_p3 = scmp.ne.s32.totalorder %s26_s25, %s1475_s12  ;;  %p1481_p5 = scmp.lt.s32.totalorder %s1475_s12, %s1475_s12 }
   0xd   :  { %p1482_p6 = por %p1481_p5, %p1480_p4 }
   0xf   :  { %p1483_p7 = pnand %p1482_p6, %p1476_p3 }
  0x11   :  { %1486 = shalt.err (!%p1483_p7)
}
  0x12   :  { %28 = dma.hbm_to_vmem [thread:$0]  %s1966_s2, 128, %s26_s25, [#allocation4]  }
  0x13   :  { %s1487_s17 = scalar_lea.hbm %s1968_s4, 768 }
  0x14   :  { %p1488_p8 = scmp.ne.s32.totalorder %s1968_s4, %s1487_s17  ;;  %p1491_p9 = scmp.lt.u32.totalorder %s1487_s17, %s1968_s4 }
  0x16   :  { %p1493_p10 = pnand %p1491_p9, %p1488_p8 }
  0x18   :  { %1496 = shalt.err (!%p1493_p10)
}
  0x19   :  { %s1497_s22 = scalar_lea.vmem %s1588_s27, 768  ;;  %p1502_p12 = scmp.lt.s32.totalorder %s1588_s27, %s1588_s27 }
  0x1a   :  { %p1498_p11 = scmp.ne.s32.totalorder %s1588_s27, %s1497_s22  ;;  %p1503_p13 = scmp.lt.s32.totalorder %s1497_s22, %s1497_s22 }
  0x1c   :  { %p1504_p0 = por %p1503_p13, %p1502_p12 }
  0x1e   :  { %p1505_p1 = pnand %p1504_p0, %p1498_p11 }
  0x20   :  { %1508 = shalt.err (!%p1505_p1)
}
  0x21   :  { %s1539_s2 = smov 64   ;;  %s1540_s23 = smov 4  }
  0x22   :  { %42 = dma.hbm_to_vmem [thread:$0]  %s1968_s4, 768, %s1588_s27, [#allocation7], %s1539_s2, %s1539_s2, %s1540_s23  }
  0x23   :  { %1531 = dma.done.wait [#allocation4], 128  }
  0x24   :  { %1532 = vsyncadd [#allocation4], 4294967168 }
  0x25   :  { %1533 = dma.done.wait [#allocation7], 768  }
  0x26   :  { %1534 = vsyncadd [#allocation7], 4294966528  ;;  %v1541_v0 = vmov 0.0   ;;  %vm1542_vm0 = vmmov 0   ;;  %v1627_v1 = vld [vmem:[%s1970_s6] sm:$0xff]  ;;  %s1543_s29 = smov 32  }
  0x27   :  { %1260 = vmatprep.subr.bf16.mxu1 %v1541_v0  ;;  %1272 = vmatprep.mubr.msk.bf16.mxu1 %vm1542_vm0, %v1541_v0  ;;  %v1401_v2 = vld [vmem:[%s1967_s3] sm:$0xff]   ;;  %v1402_v3 = vld [vmem:[%s1967_s3 + $0x8] sm:$0xff]   ;;  %v1403_v4 = vld [vmem:[%s1967_s3 + $0x10] sm:$0xff]   ;;  %vm137_vm1 = vcmask 785408   ;;  %vm246_vm2 = vcmask 261120   ;;  %vm248_vm3 = vcmask 523264  }
  0x28   :  { %240 = vrot.lane.b32.xlu0 %v1627_v1, %s1543_s29  ;;  %1240 = vmatprep.subr.bf16.mxu0 %v1401_v2  ;;  %v1642_v5 = vld [vmem:[#allocation6] sm:$0xff]   ;;  %v1645_v6 = vld [vmem:[#allocation6 + $0x8] sm:$0xff]   ;;  %v1404_v7 = vld [vmem:[%s1967_s3 + $0x18] sm:$0xff]   ;;  %v1544_v46 = vmov 0   ;;  %s1545_s15 = smov [#allocation8]  }
  0x29   :  { %1241 = vmatpush3.bf16.msra.mxu0 %v1401_v2  ;;  %1261 = vmatpush3.bf16.msra.mxu1 %v1642_v5  ;;  %v1410_v8 = vld [vmem:[%s1964_s0] sm:$0xff]   ;;  %v1655_v9 = vld [vmem:[#allocation6 + $0x10] sm:$0xff]   ;;  %v1408_v12 = vld [vmem:[%s1967_s3 + $0x28] sm:$0xff]   ;;  %s1117_s16 = sshll.u32 %s1545_s15, 4  ;;  %s1118_s16 = int_to_ptr.vmem [resolvable:$true] %s1117_s16 }
  0x2a   :  { %1242 = vmatprep.subr.bf16.mxu0 %v1402_v3  ;;  %1262 = vmatprep.subr.bf16.mxu1 %v1541_v0  ;;  %v1406_v10 = vld [vmem:[%s1967_s3 + $0x20] sm:$0xff]   ;;  %v1670_v13 = vld [vmem:[#allocation6 + $0x20] sm:$0xff]   ;;  %v1677_v15 = vld [vmem:[#allocation6 + $0x28] sm:$0xff]   ;;  %p1514_p3 = scmp.lt.s32.totalorder %s1118_s16, %s1118_s16 }
  0x2b   :  { %1252 = vmatprep.mubr.msk.bf16.mxu0 %vm137_vm1, %v1410_v8  ;;  %v1662_v11 = vld [vmem:[#allocation6 + $0x18] sm:$0xff]   ;;  %v1411_v14 = vld [vmem:[%s1964_s0 + $0x8] sm:$0xff]   ;;  %1399 = vset.pattern.permute.xlu0 %v1544_v46  ;;  %v1415_v53 = vld [vmem:[%s1964_s0 + $0x10] sm:$0xff]  }
  0x2c   :  { %243 = vrot.lane.b32.xlu0 %v1627_v1, %s1539_s2  ;;  %v1696_v17 = vld [vmem:[#allocation3] sm:$0xff]  ;;  %1400 = vset.pattern.permute.xlu1 %v1544_v46  ;;  %v1416_v54 = vld [vmem:[%s1964_s0 + $0x18] sm:$0xff]  }
  0x2d   :  { %1243 = vmatpush3.bf16.msra.mxu0 %v1402_v3  ;;  %1263 = vmatpush3.bf16.msra.mxu1 %v1645_v6  ;;  %v1723_v23 = vld [vmem:[%s1969_s5] ss:$0 sm:$0xff] }
  0x2e   :  { %1244 = vmatprep.subr.bf16.mxu0 %v1403_v4  ;;  %1264 = vmatprep.subr.bf16.mxu1 %v1541_v0  ;;  %v237_v48 = vld [vmem:[%s1965_s1] sm:$0xff] }
  0x31   :  { %1245 = vmatpush3.bf16.msra.mxu0 %v1403_v4  ;;  %1265 = vmatpush3.bf16.msra.mxu1 %v1655_v9 }
  0x32   :  { %1246 = vmatprep.subr.bf16.mxu0 %v1404_v7  ;;  %1266 = vmatprep.subr.bf16.mxu1 %v1541_v0 }
  0x35   :  { %1247 = vmatpush3.bf16.msra.mxu0 %v1404_v7  ;;  %1267 = vmatpush3.bf16.msra.mxu1 %v1662_v11 }
  0x36   :  { %1248 = vmatprep.subr.bf16.mxu0 %v1406_v10  ;;  %1268 = vmatprep.subr.bf16.mxu1 %v1541_v0 }
  0x39   :  { %1249 = vmatpush3.bf16.msra.mxu0 %v1406_v10  ;;  %1269 = vmatpush3.bf16.msra.mxu1 %v1670_v13 }
  0x3a   :  { %1250 = vmatprep.subr.bf16.mxu0 %v1408_v12  ;;  %1270 = vmatprep.subr.bf16.mxu1 %v1541_v0 }
  0x3d   :  { %1251 = vmatpush3.bf16.msra.mxu0 %v1408_v12  ;;  %1271 = vmatpush3.bf16.msra.mxu1 %v1677_v15 }
  0x3e   :  { %1276 = vmatprep.subr.bf16.mxu0 %v1541_v0  ;;  %1292 = vmatprep.subr.bf16.mxu1 %v1541_v0 }
  0x40   :  { %1253 = vmatmul.mubr.msk.bf16.vlgmr.msra.gmra.mrb[0].mxu0 %vm137_vm1, %v1411_v14 }
  0x41   :  { %1277 = vmatpush3.bf16.msra.mxu0 %v1642_v5  ;;  %1256 = vmatprep.mubr.msk.bf16.mxu0 %vm137_vm1, %v1415_v53 }
  0x42   :  { %1278 = vmatprep.subr.bf16.mxu0 %v1541_v0 }
  0x45   :  { %1279 = vmatpush3.bf16.msra.mxu0 %v1645_v6 }
  0x46   :  { %1280 = vmatprep.subr.bf16.mxu0 %v1541_v0 }
  0x48   :  { %1257 = vmatmul.mubr.msk.bf16.gmra.mrb[4].mxu0 %vm137_vm1, %v1416_v54 }
  0x49   :  { %1281 = vmatpush3.bf16.msra.mxu0 %v1655_v9  ;;  %1288 = vmatprep.mubr.msk.bf16.mxu0 %vm1542_vm0, %v1541_v0 }
  0x4a   :  { %1282 = vmatprep.subr.bf16.mxu0 %v1541_v0 }
  0x4d   :  { %1283 = vmatpush3.bf16.msra.mxu0 %v1662_v11 }
  0x4e   :  { %1284 = vmatprep.subr.bf16.mxu0 %v1541_v0 }
  0x51   :  { %1285 = vmatpush3.bf16.msra.mxu0 %v1670_v13 }
  0x52   :  { %1286 = vmatprep.subr.bf16.mxu0 %v1541_v0 }
  0x55   :  { %1287 = vmatpush3.bf16.msra.mxu0 %v1677_v15 }
  0x56   :  { %1308 = vmatprep.subr.bf16.mxu0 %v1541_v0 }
  0x9a   :  { %v241_v16 = vpop.permute.xlu0 %240 }
  0x9b   :  { %v247_v18 = vsel %vm246_vm2, %v1627_v1, %v241_v16 }
  0x9e   :  { %v1700_v19 = vpop.permute.xlu0 %243 }
  0x9f   :  { %v249_v20 = vsel %vm248_vm3, %v247_v18, %v1700_v19 }
  0xa0   :  { %v250_v21 = vmul.f32 %v249_v20, %v1696_v17 }
  0xa2   :  { %v251_v22 = vpack.c.bf16 %v250_v21, %v250_v21 }
  0xa4   :  { %1273 = vmatmul.mubr.msk.bf16.vlgmr.msra.gmra.mrb[0].mxu1 %vm137_vm1, %v251_v22 }
  0xa5   :  { %1293 = vmatpush3.bf16.msra.mxu1 %v1642_v5  ;;  %1304 = vmatprep.mubr.msk.bf16.mxu1 %vm1542_vm0, %v1541_v0 }
  0xa6   :  { %1294 = vmatprep.subr.bf16.mxu1 %v1541_v0 }
  0xa9   :  { %1295 = vmatpush3.bf16.msra.mxu1 %v1645_v6 }
  0xaa   :  { %1296 = vmatprep.subr.bf16.mxu1 %v1541_v0 }
  0xad   :  { %1297 = vmatpush3.bf16.msra.mxu1 %v1655_v9 }
  0xae   :  { %1298 = vmatprep.subr.bf16.mxu1 %v1541_v0 }
  0xb1   :  { %1299 = vmatpush3.bf16.msra.mxu1 %v1662_v11 }
  0xb2   :  { %1300 = vmatprep.subr.bf16.mxu1 %v1541_v0 }
  0xb5   :  { %1301 = vmatpush3.bf16.msra.mxu1 %v1670_v13 }
  0xb6   :  { %1302 = vmatprep.subr.bf16.mxu1 %v1541_v0 }
  0xb9   :  { %1303 = vmatpush3.bf16.msra.mxu1 %v1677_v15 }
  0xba   :  { %1324 = vmatprep.subr.bf16.mxu1 %v1541_v0 }
 0x113   :  { %v1254_v24 = vpop.f32.mrb[0].mxu0 }
 0x114   :  { %v193_v25 = vadd.f32 %v1254_v24, %v1723_v23  ;;  %v184_v26 = vpop.f32.mrb[1].mxu0 }
 0x115   :  { %v185_v27 = vadd.f32 %v1723_v23, %v184_v26  ;;  %v1255_v28 = vpop.f32.mrb[2].mxu0 }
 0x116   :  { %217 = vst.msk [vmem:[#allocation2 + $0x10] sm:$0xff] %vm137_vm1, %v193_v25  ;;  %v196_v29 = vadd.f32 %v1255_v28, %v1723_v23  ;;  %v187_v30 = vpop.f32.mrb[3].mxu0 }
 0x117   :  { %215 = vst.msk [vmem:[#allocation2] sm:$0xff] %vm137_vm1, %v185_v27  ;;  %v188_v31 = vadd.f32 %v1723_v23, %v187_v30 }
 0x118   :  { %218 = vst.msk [vmem:[#allocation2 + $0x18] sm:$0xff] %vm137_vm1, %v196_v29 }
 0x119   :  { %216 = vst.msk [vmem:[#allocation2 + $0x8] sm:$0xff] %vm137_vm1, %v188_v31 }
 0x11b   :  { %v1258_v62 = vpop.f32.mrb[4].mxu0 }
 0x11c   :  { %v209_v63 = vadd.f32 %v1258_v62, %v1723_v23  ;;  %v200_v2 = vpop.f32.mrb[5].mxu0 }
 0x11d   :  { %v201_v3 = vadd.f32 %v1723_v23, %v200_v2  ;;  %v1259_v4 = vpop.f32.mrb[6].mxu0 }
 0x11e   :  { %v238_v36 = vld [vmem:[#allocation2] sm:$0xff]  ;;  %221 = vst.msk [vmem:[#allocation2 + $0x30] sm:$0xff] %vm137_vm1, %v209_v63  ;;  %v203_v7 = vpop.f32.mrb[7].mxu0 }
 0x11f   :  { %219 = vst.msk [vmem:[#allocation2 + $0x20] sm:$0xff] %vm137_vm1, %v201_v3  ;;  %v204_v8 = vadd.f32 %v1723_v23, %v203_v7  ;;  %v1156_v7 = vld [vmem:[%s1965_s1 + $0x10] sm:$0xff] }
 0x120   :  { %v380_v24 = vld [vmem:[#allocation2 + $0x8] sm:$0xff] }
 0x121   :  { %220 = vst.msk [vmem:[#allocation2 + $0x28] sm:$0xff] %vm137_vm1, %v204_v8 }
 0x177   :  { %v325_v32 = vpop.f32.mrb[0].mxu1 }
 0x178   :  { %339 = vrot.lane.b32.xlu1 %v325_v32, %s1539_s2  ;;  %v1274_v33 = vpop.f32.mrb[1].mxu1  ;;  %v331_v37 = vadd.f32 %v325_v32, %v238_v36 }
 0x179   :  { %v328_v34 = vpop.f32.mrb[2].mxu1 }
 0x17a   :  { %v1275_v35 = vpop.f32.mrb[3].mxu1  ;;  %v1152_v38 = vmul.f32 -1.442695, %v331_v37 }
 0x17b   :  { %v1153_v35 = vld [vmem:[%s1965_s1 + $0x8] sm:$0xff] }
 0x17c   :  { %1417 = vpow2.f32 %v1152_v38 }
 0x186   :  { %v1418_v39 = vpop.eup %1417 }
 0x187   :  { %v335_v40 = vadd.f32 1.0, %v1418_v39 }
 0x189   :  { %1419 = vrcp.f32 %v335_v40 }
 0x193   :  { %v1420_v41 = vpop.eup %1419 }
 0x1ea   :  { %v340_v42 = vpop.permute.xlu1 %339 }
 0x1eb   :  { %v342_v43 = vmul.f32 %v1420_v41, %v340_v42 }
 0x1ed   :  { %344 = vrot.lane.b32.xlu1 %v342_v43, %s1539_s2 }
 0x25f   :  { %v345_v44 = vpop.permute.xlu1 %344 }
 0x260   :  { %v347_v45 = vadd.f32 %v345_v44, %v238_v36 }
 0x262   :  { %1421 = vtanh.f32 %v347_v45 }
 0x26c   :  { %v1422_v47 = vpop.eup %1421 }
 0x26d   :  { %350 = vrot.lane.b32.xlu0 %v1422_v47, %s1539_s2 }
 0x271   :  { %367 = vperm.xlu0 %1399, %v237_v48  }
 0x2df   :  { %v351_v49 = vpop.permute.xlu0 %350 }
 0x2e0   :  { %v353_v50 = vsub.f32 %v1627_v1, %v351_v49 }
 0x2e2   :  { %355 = vrot.lane.b32.xlu1 %v353_v50, %s1543_s29 }
 0x2f0   :  { %v368_v57 = vpop.permute.xlu0 %367 }
 0x354   :  { %v356_v51 = vpop.permute.xlu1 %355 }
 0x355   :  { %v358_v52 = vmul.f32 %v1420_v41, %v356_v51 }
 0x357   :  { %360 = vrot.lane.b32.xlu1 %v358_v52, %s1543_s29 }
 0x3c9   :  { %v361_v55 = vpop.permute.xlu1 %360 }
 0x3ca   :  { %v363_v56 = vadd.f32 %v1422_v47, %v361_v55 }
 0x3cc   :  { %v364_v58 = vsub.f32 %v363_v56, %v1700_v19 }
 0x3ce   :  { %v370_v59 = vmul.f32 %v368_v57, %v364_v58  ;;  %v485_v57 = vld [vmem:[#allocation2 + $0x10] sm:$0xff] }
 0x3d0   :  { %372 = vrot.lane.b32.xlu1 %v370_v59, %s1539_s2 }
 0x442   :  { %v373_v60 = vpop.permute.xlu1 %372 }
 0x443   :  { %v1755_v61 = vadd.f32 %v373_v60, %v1627_v1  ;;  %v212_v1 = vadd.f32 %v1259_v4, %v1723_v23 }
 0x445   :  { %376 = vst.msk [vmem:[#allocation8] sm:$0xff] %vm246_vm2, %v1755_v61  ;;  %385 = vrot.lane.b32.xlu1 %v1755_v61, %s1539_s2  ;;  %382 = vrot.lane.b32.xlu0 %v1755_v61, %s1543_s29 }
 0x446   :  { %222 = vst.msk [vmem:[#allocation2 + $0x38] sm:$0xff] %vm137_vm1, %v212_v1 }
 0x4b7   :  { %v386_v10 = vpop.permute.xlu1 %385  ;;  %v383_v12 = vpop.permute.xlu0 %382 }
 0x4b8   :  { %v388_v14 = vsel %vm246_vm2, %v1755_v61, %v383_v12 }
 0x4b9   :  { %v389_v16 = vsel %vm248_vm3, %v388_v14, %v386_v10 }
 0x4ba   :  { %v390_v18 = vmul.f32 %v389_v16, %v1696_v17 }
 0x4bc   :  { %v391_v19 = vpack.c.bf16 %v390_v18, %v390_v18 }
 0x4be   :  { %1289 = vmatmul.mubr.msk.bf16.vlgmr.msra.gmra.mrb[8].mxu0 %vm137_vm1, %v391_v19 }
 0x4bf   :  { %1309 = vmatpush3.bf16.msra.mxu0 %v1642_v5  ;;  %1320 = vmatprep.mubr.msk.bf16.mxu0 %vm1542_vm0, %v1541_v0 }
 0x4c0   :  { %1310 = vmatprep.subr.bf16.mxu0 %v1541_v0 }
 0x4c3   :  { %1311 = vmatpush3.bf16.msra.mxu0 %v1645_v6 }
 0x4c4   :  { %1312 = vmatprep.subr.bf16.mxu0 %v1541_v0 }
 0x4c7   :  { %1313 = vmatpush3.bf16.msra.mxu0 %v1655_v9 }
 0x4c8   :  { %1314 = vmatprep.subr.bf16.mxu0 %v1541_v0 }
 0x4cb   :  { %1315 = vmatpush3.bf16.msra.mxu0 %v1662_v11 }
 0x4cc   :  { %1316 = vmatprep.subr.bf16.mxu0 %v1541_v0 }
 0x4cf   :  { %1317 = vmatpush3.bf16.msra.mxu0 %v1670_v13 }
 0x4d0   :  { %1318 = vmatprep.subr.bf16.mxu0 %v1541_v0 }
 0x4d3   :  { %1319 = vmatpush3.bf16.msra.mxu0 %v1677_v15 }
 0x4d4   :  { %1340 = vmatprep.subr.bf16.mxu0 %v1541_v0 }
 0x591   :  { %v429_v20 = vpop.f32.mrb[8].mxu0 }
 0x592   :  { %443 = vrot.lane.b32.xlu0 %v429_v20, %s1539_s2  ;;  %v1290_v21 = vpop.f32.mrb[9].mxu0  ;;  %v435_v25 = vadd.f32 %v429_v20, %v380_v24 }
 0x593   :  { %v432_v22 = vpop.f32.mrb[10].mxu0 }
 0x594   :  { %v1291_v23 = vpop.f32.mrb[11].mxu0  ;;  %v1155_v26 = vmul.f32 -1.442695, %v435_v25 }
 0x596   :  { %1423 = vpow2.f32 %v1155_v26 }
 0x5a0   :  { %v1424_v27 = vpop.eup %1423 }
 0x5a1   :  { %v439_v28 = vadd.f32 1.0, %v1424_v27 }
 0x5a3   :  { %1425 = vrcp.f32 %v439_v28 }
 0x5ad   :  { %v1426_v29 = vpop.eup %1425 }
 0x604   :  { %v444_v30 = vpop.permute.xlu0 %443 }
 0x605   :  { %v446_v31 = vmul.f32 %v1426_v29, %v444_v30 }
 0x607   :  { %448 = vrot.lane.b32.xlu1 %v446_v31, %s1539_s2 }
 0x679   :  { %v449_v32 = vpop.permute.xlu1 %448 }
 0x67a   :  { %v451_v33 = vadd.f32 %v449_v32, %v380_v24 }
 0x67c   :  { %1427 = vtanh.f32 %v451_v33 }
 0x686   :  { %v1428_v34 = vpop.eup %1427 }
 0x687   :  { %454 = vrot.lane.b32.xlu0 %v1428_v34, %s1539_s2 }
 0x68b   :  { %471 = vperm.xlu0 %1399, %v1153_v35  }
 0x6f9   :  { %v455_v36 = vpop.permute.xlu0 %454 }
 0x6fa   :  { %v457_v37 = vsub.f32 %v1755_v61, %v455_v36 }
 0x6fc   :  { %459 = vrot.lane.b32.xlu1 %v457_v37, %s1543_s29 }
 0x70a   :  { %v472_v43 = vpop.permute.xlu0 %471 }
 0x76e   :  { %v460_v38 = vpop.permute.xlu1 %459 }
 0x76f   :  { %v462_v39 = vmul.f32 %v1426_v29, %v460_v38 }
 0x771   :  { %464 = vrot.lane.b32.xlu1 %v462_v39, %s1543_s29 }
 0x7e3   :  { %v465_v40 = vpop.permute.xlu1 %464 }
 0x7e4   :  { %v467_v41 = vadd.f32 %v1428_v34, %v465_v40  ;;  %v590_v34 = vld [vmem:[#allocation2 + $0x18] sm:$0xff] }
 0x7e6   :  { %v468_v42 = vsub.f32 %v467_v41, %v386_v10 }
 0x7e8   :  { %v474_v44 = vmul.f32 %v472_v43, %v468_v42 }
 0x7ea   :  { %476 = vrot.lane.b32.xlu0 %v474_v44, %s1539_s2 }
 0x85c   :  { %v477_v45 = vpop.permute.xlu0 %476 }
 0x85d   :  { %v479_v46 = vadd.f32 %v477_v45, %v1755_v61  ;;  %v1159_v45 = vld [vmem:[%s1965_s1 + $0x18] sm:$0xff] }
 0x85f   :  { %481 = vst.msk [vmem:[#allocation8 + $0x8] sm:$0xff] %vm246_vm2, %v479_v46  ;;  %490 = vrot.lane.b32.xlu0 %v479_v46, %s1539_s2  ;;  %487 = vrot.lane.b32.xlu1 %v479_v46, %s1543_s29 }
 0x8d1   :  { %v491_v47 = vpop.permute.xlu0 %490  ;;  %v488_v48 = vpop.permute.xlu1 %487 }
 0x8d2   :  { %v493_v49 = vsel %vm246_vm2, %v479_v46, %v488_v48 }
 0x8d3   :  { %v494_v50 = vsel %vm248_vm3, %v493_v49, %v491_v47 }
 0x8d4   :  { %v495_v51 = vmul.f32 %v494_v50, %v1696_v17 }
 0x8d6   :  { %v496_v52 = vpack.c.bf16 %v495_v51, %v495_v51 }
 0x8d8   :  { %1305 = vmatmul.mubr.msk.bf16.vlgmr.msra.gmra.mrb[4].mxu1 %vm137_vm1, %v496_v52 }
 0x8d9   :  { %1325 = vmatpush3.bf16.msra.mxu1 %v1642_v5  ;;  %1336 = vmatprep.mubr.msk.bf16.mxu1 %vm1542_vm0, %v1541_v0 }
 0x8da   :  { %1326 = vmatprep.subr.bf16.mxu1 %v1541_v0 }
 0x8dd   :  { %1327 = vmatpush3.bf16.msra.mxu1 %v1645_v6 }
 0x8de   :  { %1328 = vmatprep.subr.bf16.mxu1 %v1541_v0 }
 0x8e1   :  { %1329 = vmatpush3.bf16.msra.mxu1 %v1655_v9 }
 0x8e2   :  { %1330 = vmatprep.subr.bf16.mxu1 %v1541_v0 }
 0x8e5   :  { %1331 = vmatpush3.bf16.msra.mxu1 %v1662_v11 }
 0x8e6   :  { %1332 = vmatprep.subr.bf16.mxu1 %v1541_v0 }
 0x8e9   :  { %1333 = vmatpush3.bf16.msra.mxu1 %v1670_v13 }
 0x8ea   :  { %1334 = vmatprep.subr.bf16.mxu1 %v1541_v0 }
 0x8ed   :  { %1335 = vmatpush3.bf16.msra.mxu1 %v1677_v15 }
 0x8ee   :  { %1356 = vmatprep.subr.bf16.mxu1 %v1541_v0 }
 0x9ab   :  { %v534_v53 = vpop.f32.mrb[4].mxu1 }
 0x9ac   :  { %548 = vrot.lane.b32.xlu1 %v534_v53, %s1539_s2  ;;  %v1306_v54 = vpop.f32.mrb[5].mxu1  ;;  %v540_v58 = vadd.f32 %v534_v53, %v485_v57 }
 0x9ad   :  { %v537_v55 = vpop.f32.mrb[6].mxu1 }
 0x9ae   :  { %v1307_v56 = vpop.f32.mrb[7].mxu1  ;;  %v1158_v59 = vmul.f32 -1.442695, %v540_v58 }
 0x9b0   :  { %1429 = vpow2.f32 %v1158_v59 }
 0x9ba   :  { %v1430_v60 = vpop.eup %1429 }
 0x9bb   :  { %v544_v61 = vadd.f32 1.0, %v1430_v60 }
 0x9bd   :  { %1431 = vrcp.f32 %v544_v61 }
 0x9c7   :  { %v1432_v62 = vpop.eup %1431 }
 0xa1e   :  { %v549_v63 = vpop.permute.xlu1 %548 }
 0xa1f   :  { %v551_v2 = vmul.f32 %v1432_v62, %v549_v63 }
 0xa21   :  { %553 = vrot.lane.b32.xlu0 %v551_v2, %s1539_s2 }
 0xa93   :  { %v554_v3 = vpop.permute.xlu0 %553 }
 0xa94   :  { %v556_v4 = vadd.f32 %v554_v3, %v485_v57 }
 0xa96   :  { %1433 = vtanh.f32 %v556_v4 }
 0xaa0   :  { %v1434_v1 = vpop.eup %1433 }
 0xaa1   :  { %559 = vrot.lane.b32.xlu1 %v1434_v1, %s1539_s2 }
 0xaa5   :  { %576 = vperm.xlu1 %1400, %v1156_v7  }
 0xb13   :  { %v560_v8 = vpop.permute.xlu1 %559 }
 0xb14   :  { %v562_v10 = vsub.f32 %v479_v46, %v560_v8 }
 0xb16   :  { %564 = vrot.lane.b32.xlu0 %v562_v10, %s1543_s29 }
 0xb24   :  { %v577_v19 = vpop.permute.xlu1 %576 }
 0xb88   :  { %v565_v12 = vpop.permute.xlu0 %564 }
 0xb89   :  { %v567_v14 = vmul.f32 %v1432_v62, %v565_v12 }
 0xb8b   :  { %569 = vrot.lane.b32.xlu0 %v567_v14, %s1543_s29 }
 0xbfd   :  { %v570_v16 = vpop.permute.xlu0 %569 }
 0xbfe   :  { %v572_v18 = vadd.f32 %v1434_v1, %v570_v16  ;;  %v695_v1 = vld [vmem:[#allocation2 + $0x20] sm:$0xff] }
 0xc00   :  { %v573_v20 = vsub.f32 %v572_v18, %v491_v47 }
 0xc02   :  { %v579_v21 = vmul.f32 %v577_v19, %v573_v20 }
 0xc04   :  { %581 = vrot.lane.b32.xlu1 %v579_v21, %s1539_s2 }
 0xc76   :  { %v582_v22 = vpop.permute.xlu1 %581 }
 0xc77   :  { %v584_v23 = vadd.f32 %v582_v22, %v479_v46  ;;  %v1162_v22 = vld [vmem:[%s1965_s1 + $0x20] sm:$0xff] }
 0xc79   :  { %586 = vst.msk [vmem:[#allocation8 + $0x10] sm:$0xff] %vm246_vm2, %v584_v23  ;;  %595 = vrot.lane.b32.xlu1 %v584_v23, %s1539_s2  ;;  %592 = vrot.lane.b32.xlu0 %v584_v23, %s1543_s29 }
 0xceb   :  { %v596_v24 = vpop.permute.xlu1 %595  ;;  %v593_v25 = vpop.permute.xlu0 %592 }
 0xcec   :  { %v598_v26 = vsel %vm246_vm2, %v584_v23, %v593_v25 }
 0xced   :  { %v599_v27 = vsel %vm248_vm3, %v598_v26, %v596_v24 }
 0xcee   :  { %v600_v28 = vmul.f32 %v599_v27, %v1696_v17 }
 0xcf0   :  { %v601_v29 = vpack.c.bf16 %v600_v28, %v600_v28 }
 0xcf2   :  { %1321 = vmatmul.mubr.msk.bf16.vlgmr.msra.gmra.mrb[12].mxu0 %vm137_vm1, %v601_v29 }
 0xcf3   :  { %1341 = vmatpush3.bf16.msra.mxu0 %v1642_v5  ;;  %1352 = vmatprep.mubr.msk.bf16.mxu0 %vm1542_vm0, %v1541_v0 }
 0xcf4   :  { %1342 = vmatprep.subr.bf16.mxu0 %v1541_v0 }
 0xcf7   :  { %1343 = vmatpush3.bf16.msra.mxu0 %v1645_v6 }
 0xcf8   :  { %1344 = vmatprep.subr.bf16.mxu0 %v1541_v0 }
 0xcfb   :  { %1345 = vmatpush3.bf16.msra.mxu0 %v1655_v9 }
 0xcfc   :  { %1346 = vmatprep.subr.bf16.mxu0 %v1541_v0 }
 0xcff   :  { %1347 = vmatpush3.bf16.msra.mxu0 %v1662_v11 }
 0xd00   :  { %1348 = vmatprep.subr.bf16.mxu0 %v1541_v0 }
 0xd03   :  { %1349 = vmatpush3.bf16.msra.mxu0 %v1670_v13 }
 0xd04   :  { %1350 = vmatprep.subr.bf16.mxu0 %v1541_v0 }
 0xd07   :  { %1351 = vmatpush3.bf16.msra.mxu0 %v1677_v15 }
 0xd08   :  { %1372 = vmatprep.subr.bf16.mxu0 %v1541_v0 }
 0xdc5   :  { %v639_v30 = vpop.f32.mrb[12].mxu0 }
 0xdc6   :  { %653 = vrot.lane.b32.xlu0 %v639_v30, %s1539_s2  ;;  %v1322_v31 = vpop.f32.mrb[13].mxu0  ;;  %v645_v35 = vadd.f32 %v639_v30, %v590_v34 }
 0xdc7   :  { %v642_v32 = vpop.f32.mrb[14].mxu0 }
 0xdc8   :  { %v1323_v33 = vpop.f32.mrb[15].mxu0  ;;  %v1161_v36 = vmul.f32 -1.442695, %v645_v35 }
 0xdca   :  { %1435 = vpow2.f32 %v1161_v36 }
 0xdd4   :  { %v1436_v37 = vpop.eup %1435 }
 0xdd5   :  { %v649_v38 = vadd.f32 1.0, %v1436_v37 }
 0xdd7   :  { %1437 = vrcp.f32 %v649_v38 }
 0xde1   :  { %v1438_v39 = vpop.eup %1437 }
 0xe38   :  { %v654_v40 = vpop.permute.xlu0 %653 }
 0xe39   :  { %v656_v41 = vmul.f32 %v1438_v39, %v654_v40 }
 0xe3b   :  { %658 = vrot.lane.b32.xlu1 %v656_v41, %s1539_s2 }
 0xead   :  { %v659_v42 = vpop.permute.xlu1 %658 }
 0xeae   :  { %v661_v43 = vadd.f32 %v659_v42, %v590_v34  ;;  %v800_v42 = vld [vmem:[#allocation2 + $0x28] sm:$0xff] }
 0xeb0   :  { %1439 = vtanh.f32 %v661_v43 }
 0xeba   :  { %v1440_v44 = vpop.eup %1439 }
 0xebb   :  { %664 = vrot.lane.b32.xlu0 %v1440_v44, %s1539_s2 }
 0xebf   :  { %681 = vperm.xlu0 %1399, %v1159_v45  }
 0xf2d   :  { %v665_v46 = vpop.permute.xlu0 %664 }
 0xf2e   :  { %v667_v47 = vsub.f32 %v584_v23, %v665_v46 }
 0xf30   :  { %669 = vrot.lane.b32.xlu1 %v667_v47, %s1543_s29 }
 0xf3e   :  { %v682_v53 = vpop.permute.xlu0 %681 }
 0xfa2   :  { %v670_v48 = vpop.permute.xlu1 %669 }
 0xfa3   :  { %v672_v49 = vmul.f32 %v1438_v39, %v670_v48  ;;  %v1165_v48 = vld [vmem:[%s1965_s1 + $0x28] sm:$0xff] }
 0xfa5   :  { %674 = vrot.lane.b32.xlu1 %v672_v49, %s1543_s29 }
0x1017   :  { %v675_v50 = vpop.permute.xlu1 %674 }
0x1018   :  { %v677_v51 = vadd.f32 %v1440_v44, %v675_v50 }
0x101a   :  { %v678_v52 = vsub.f32 %v677_v51, %v596_v24 }
0x101c   :  { %v684_v54 = vmul.f32 %v682_v53, %v678_v52 }
0x101e   :  { %686 = vrot.lane.b32.xlu0 %v684_v54, %s1539_s2 }
0x1090   :  { %v687_v55 = vpop.permute.xlu0 %686 }
0x1091   :  { %v689_v56 = vadd.f32 %v687_v55, %v584_v23 }
0x1093   :  { %691 = vst.msk [vmem:[#allocation8 + $0x18] sm:$0xff] %vm246_vm2, %v689_v56  ;;  %700 = vrot.lane.b32.xlu0 %v689_v56, %s1539_s2  ;;  %697 = vrot.lane.b32.xlu1 %v689_v56, %s1543_s29 }
0x1105   :  { %v701_v57 = vpop.permute.xlu0 %700  ;;  %v698_v58 = vpop.permute.xlu1 %697 }
0x1106   :  { %v703_v59 = vsel %vm246_vm2, %v689_v56, %v698_v58 }
0x1107   :  { %v704_v60 = vsel %vm248_vm3, %v703_v59, %v701_v57 }
0x1108   :  { %v705_v61 = vmul.f32 %v704_v60, %v1696_v17 }
0x110a   :  { %v706_v62 = vpack.c.bf16 %v705_v61, %v705_v61 }
0x110c   :  { %1337 = vmatmul.mubr.msk.bf16.vlgmr.msra.gmra.mrb[8].mxu1 %vm137_vm1, %v706_v62 }
0x110d   :  { %1357 = vmatpush3.bf16.msra.mxu1 %v1642_v5  ;;  %1368 = vmatprep.mubr.msk.bf16.mxu1 %vm1542_vm0, %v1541_v0 }
0x110e   :  { %1358 = vmatprep.subr.bf16.mxu1 %v1541_v0 }
0x1111   :  { %1359 = vmatpush3.bf16.msra.mxu1 %v1645_v6 }
0x1112   :  { %1360 = vmatprep.subr.bf16.mxu1 %v1541_v0 }
0x1115   :  { %1361 = vmatpush3.bf16.msra.mxu1 %v1655_v9 }
0x1116   :  { %1362 = vmatprep.subr.bf16.mxu1 %v1541_v0 }
0x1119   :  { %1363 = vmatpush3.bf16.msra.mxu1 %v1662_v11 }
0x111a   :  { %1364 = vmatprep.subr.bf16.mxu1 %v1541_v0 }
0x111d   :  { %1365 = vmatpush3.bf16.msra.mxu1 %v1670_v13 }
0x111e   :  { %1366 = vmatprep.subr.bf16.mxu1 %v1541_v0 }
0x1121   :  { %1367 = vmatpush3.bf16.msra.mxu1 %v1677_v15 }
0x11df   :  { %v744_v63 = vpop.f32.mrb[8].mxu1 }
0x11e0   :  { %758 = vrot.lane.b32.xlu1 %v744_v63, %s1539_s2  ;;  %v1338_v2 = vpop.f32.mrb[9].mxu1  ;;  %v750_v7 = vadd.f32 %v744_v63, %v695_v1 }
0x11e1   :  { %v747_v3 = vpop.f32.mrb[10].mxu1 }
0x11e2   :  { %v1339_v4 = vpop.f32.mrb[11].mxu1  ;;  %v1164_v8 = vmul.f32 -1.442695, %v750_v7 }
0x11e4   :  { %1441 = vpow2.f32 %v1164_v8 }
0x11ee   :  { %v1442_v10 = vpop.eup %1441 }
0x11ef   :  { %v754_v12 = vadd.f32 1.0, %v1442_v10  ;;  %v905_v10 = vld [vmem:[#allocation2 + $0x30] sm:$0xff] }
0x11f1   :  { %1443 = vrcp.f32 %v754_v12 }
0x11fb   :  { %v1444_v14 = vpop.eup %1443 }
0x1252   :  { %v759_v16 = vpop.permute.xlu1 %758 }
0x1253   :  { %v761_v18 = vmul.f32 %v1444_v14, %v759_v16 }
0x1255   :  { %763 = vrot.lane.b32.xlu0 %v761_v18, %s1539_s2 }
0x12c7   :  { %v764_v19 = vpop.permute.xlu0 %763 }
0x12c8   :  { %v766_v20 = vadd.f32 %v764_v19, %v695_v1 }
0x12ca   :  { %1445 = vtanh.f32 %v766_v20 }
0x12d4   :  { %v1446_v21 = vpop.eup %1445 }
0x12d5   :  { %769 = vrot.lane.b32.xlu1 %v1446_v21, %s1539_s2 }
0x12d9   :  { %786 = vperm.xlu1 %1400, %v1162_v22  }
0x1347   :  { %v770_v23 = vpop.permute.xlu1 %769 }
0x1348   :  { %v772_v24 = vsub.f32 %v689_v56, %v770_v23 }
0x134a   :  { %774 = vrot.lane.b32.xlu0 %v772_v24, %s1543_s29 }
0x1358   :  { %v787_v30 = vpop.permute.xlu1 %786 }
0x13bc   :  { %v775_v25 = vpop.permute.xlu0 %774 }
0x13bd   :  { %v777_v26 = vmul.f32 %v1444_v14, %v775_v25  ;;  %v1168_v25 = vld [vmem:[%s1965_s1 + $0x30] sm:$0xff] }
0x13bf   :  { %779 = vrot.lane.b32.xlu0 %v777_v26, %s1543_s29 }
0x1431   :  { %v780_v27 = vpop.permute.xlu0 %779 }
0x1432   :  { %v782_v28 = vadd.f32 %v1446_v21, %v780_v27 }
0x1434   :  { %v783_v29 = vsub.f32 %v782_v28, %v701_v57 }
0x1436   :  { %v789_v31 = vmul.f32 %v787_v30, %v783_v29 }
0x1438   :  { %791 = vrot.lane.b32.xlu1 %v789_v31, %s1539_s2 }
0x14aa   :  { %v792_v32 = vpop.permute.xlu1 %791 }
0x14ab   :  { %v794_v33 = vadd.f32 %v792_v32, %v689_v56 }
0x14ad   :  { %796 = vst.msk [vmem:[#allocation8 + $0x20] sm:$0xff] %vm246_vm2, %v794_v33  ;;  %805 = vrot.lane.b32.xlu1 %v794_v33, %s1539_s2  ;;  %802 = vrot.lane.b32.xlu0 %v794_v33, %s1543_s29 }
0x151f   :  { %v806_v34 = vpop.permute.xlu1 %805  ;;  %v803_v35 = vpop.permute.xlu0 %802 }
0x1520   :  { %v808_v36 = vsel %vm246_vm2, %v794_v33, %v803_v35 }
0x1521   :  { %v809_v37 = vsel %vm248_vm3, %v808_v36, %v806_v34 }
0x1522   :  { %v810_v38 = vmul.f32 %v809_v37, %v1696_v17 }
0x1524   :  { %v811_v39 = vpack.c.bf16 %v810_v38, %v810_v38 }
0x1526   :  { %1353 = vmatmul.mubr.msk.bf16.vlgmr.msra.gmra.mrb[16].mxu0 %vm137_vm1, %v811_v39 }
0x1527   :  { %1373 = vmatpush3.bf16.msra.mxu0 %v1642_v5  ;;  %1384 = vmatprep.mubr.msk.bf16.mxu0 %vm1542_vm0, %v1541_v0 }
0x1528   :  { %1374 = vmatprep.subr.bf16.mxu0 %v1541_v0 }
0x152b   :  { %1375 = vmatpush3.bf16.msra.mxu0 %v1645_v6 }
0x152c   :  { %1376 = vmatprep.subr.bf16.mxu0 %v1541_v0 }
0x152f   :  { %1377 = vmatpush3.bf16.msra.mxu0 %v1655_v9 }
0x1530   :  { %1378 = vmatprep.subr.bf16.mxu0 %v1541_v0 }
0x1533   :  { %1379 = vmatpush3.bf16.msra.mxu0 %v1662_v11 }
0x1534   :  { %1380 = vmatprep.subr.bf16.mxu0 %v1541_v0 }
0x1537   :  { %1381 = vmatpush3.bf16.msra.mxu0 %v1670_v13 }
0x1538   :  { %1382 = vmatprep.subr.bf16.mxu0 %v1541_v0 }
0x153b   :  { %1383 = vmatpush3.bf16.msra.mxu0 %v1677_v15 }
0x15f9   :  { %v849_v5 = vpop.f32.mrb[16].mxu0 }
0x15fa   :  { %863 = vrot.lane.b32.xlu0 %v849_v5, %s1539_s2  ;;  %v1354_v6 = vpop.f32.mrb[17].mxu0  ;;  %v855_v9 = vadd.f32 %v849_v5, %v800_v42 }
0x15fb   :  { %v852_v40 = vpop.f32.mrb[18].mxu0 }
0x15fc   :  { %v1355_v41 = vpop.f32.mrb[19].mxu0  ;;  %v1167_v43 = vmul.f32 -1.442695, %v855_v9 }
0x15fe   :  { %1447 = vpow2.f32 %v1167_v43 }
0x1608   :  { %v1448_v44 = vpop.eup %1447 }
0x1609   :  { %v859_v11 = vadd.f32 1.0, %v1448_v44  ;;  %v1010_v44 = vld [vmem:[#allocation2 + $0x38] sm:$0xff] }
0x160b   :  { %1449 = vrcp.f32 %v859_v11 }
0x1615   :  { %v1450_v45 = vpop.eup %1449 }
0x166c   :  { %v864_v46 = vpop.permute.xlu0 %863 }
0x166d   :  { %v866_v13 = vmul.f32 %v1450_v45, %v864_v46 }
0x166f   :  { %868 = vrot.lane.b32.xlu1 %v866_v13, %s1539_s2 }
0x16e1   :  { %v869_v0 = vpop.permute.xlu1 %868 }
0x16e2   :  { %v871_v15 = vadd.f32 %v869_v0, %v800_v42 }
0x16e4   :  { %1451 = vtanh.f32 %v871_v15 }
0x16ee   :  { %v1452_v47 = vpop.eup %1451 }
0x16ef   :  { %874 = vrot.lane.b32.xlu0 %v1452_v47, %s1539_s2 }
0x16f3   :  { %891 = vperm.xlu0 %1399, %v1165_v48  }
0x1761   :  { %v875_v49 = vpop.permute.xlu0 %874 }
0x1762   :  { %v877_v50 = vsub.f32 %v794_v33, %v875_v49 }
0x1764   :  { %879 = vrot.lane.b32.xlu1 %v877_v50, %s1543_s29  ;;  %v1171_v50 = vld [vmem:[%s1965_s1 + $0x38] sm:$0xff]  ;;  %s1509_s1 = scalar_lea.vmem %s1118_s16, 1024 }
0x1765   :  { %p1510_p2 = scmp.ne.s32.totalorder %s1118_s16, %s1509_s1  ;;  %p1515_p4 = scmp.lt.s32.totalorder %s1509_s1, %s1509_s1 }
0x1767   :  { %p1516_p5 = por %p1515_p4, %p1514_p3 }
0x1769   :  { %p1517_p6 = pnand %p1516_p5, %p1510_p2 }
0x1772   :  { %v892_v56 = vpop.permute.xlu0 %891 }
0x17d6   :  { %v880_v51 = vpop.permute.xlu1 %879 }
0x17d7   :  { %v882_v52 = vmul.f32 %v1450_v45, %v880_v51 }
0x17d9   :  { %884 = vrot.lane.b32.xlu1 %v882_v52, %s1543_s29 }
0x184b   :  { %v885_v53 = vpop.permute.xlu1 %884 }
0x184c   :  { %v887_v54 = vadd.f32 %v1452_v47, %v885_v53 }
0x184e   :  { %v888_v55 = vsub.f32 %v887_v54, %v806_v34 }
0x1850   :  { %v894_v57 = vmul.f32 %v892_v56, %v888_v55 }
0x1852   :  { %896 = vrot.lane.b32.xlu0 %v894_v57, %s1539_s2 }
0x18c4   :  { %v897_v58 = vpop.permute.xlu0 %896 }
0x18c5   :  { %v899_v59 = vadd.f32 %v897_v58, %v794_v33 }
0x18c7   :  { %901 = vst.msk [vmem:[#allocation8 + $0x28] sm:$0xff] %vm246_vm2, %v899_v59  ;;  %910 = vrot.lane.b32.xlu0 %v899_v59, %s1539_s2  ;;  %907 = vrot.lane.b32.xlu1 %v899_v59, %s1543_s29 }
0x1939   :  { %v911_v60 = vpop.permute.xlu0 %910  ;;  %v908_v61 = vpop.permute.xlu1 %907 }
0x193a   :  { %v913_v62 = vsel %vm246_vm2, %v899_v59, %v908_v61 }
0x193b   :  { %v914_v63 = vsel %vm248_vm3, %v913_v62, %v911_v60 }
0x193c   :  { %v915_v2 = vmul.f32 %v914_v63, %v1696_v17 }
0x193e   :  { %v916_v3 = vpack.c.bf16 %v915_v2, %v915_v2 }
0x1940   :  { %1369 = vmatmul.mubr.msk.bf16.vlgmr.msra.gmra.mrb[12].mxu1 %vm137_vm1, %v916_v3 }
0x1a13   :  { %v954_v4 = vpop.f32.mrb[12].mxu1 }
0x1a14   :  { %968 = vrot.lane.b32.xlu1 %v954_v4, %s1539_s2  ;;  %v1370_v1 = vpop.f32.mrb[13].mxu1  ;;  %v960_v12 = vadd.f32 %v954_v4, %v905_v10 }
0x1a15   :  { %v957_v7 = vpop.f32.mrb[14].mxu1 }
0x1a16   :  { %v1371_v8 = vpop.f32.mrb[15].mxu1  ;;  %v1170_v14 = vmul.f32 -1.442695, %v960_v12 }
0x1a18   :  { %1453 = vpow2.f32 %v1170_v14 }
0x1a22   :  { %v1454_v16 = vpop.eup %1453 }
0x1a23   :  { %v964_v18 = vadd.f32 1.0, %v1454_v16 }
0x1a25   :  { %1455 = vrcp.f32 %v964_v18 }
0x1a2f   :  { %v1456_v19 = vpop.eup %1455 }
0x1a86   :  { %v969_v20 = vpop.permute.xlu1 %968 }
0x1a87   :  { %v971_v21 = vmul.f32 %v1456_v19, %v969_v20 }
0x1a89   :  { %973 = vrot.lane.b32.xlu0 %v971_v21, %s1539_s2 }
0x1afb   :  { %v974_v22 = vpop.permute.xlu0 %973 }
0x1afc   :  { %v976_v23 = vadd.f32 %v974_v22, %v905_v10 }
0x1afe   :  { %1457 = vtanh.f32 %v976_v23 }
0x1b08   :  { %v1458_v24 = vpop.eup %1457 }
0x1b09   :  { %979 = vrot.lane.b32.xlu1 %v1458_v24, %s1539_s2 }
0x1b0d   :  { %996 = vperm.xlu1 %1400, %v1168_v25  }
0x1b7b   :  { %v980_v26 = vpop.permute.xlu1 %979 }
0x1b7c   :  { %v982_v27 = vsub.f32 %v899_v59, %v980_v26 }
0x1b7e   :  { %984 = vrot.lane.b32.xlu0 %v982_v27, %s1543_s29 }
0x1b8c   :  { %v997_v33 = vpop.permute.xlu1 %996 }
0x1bf0   :  { %v985_v28 = vpop.permute.xlu0 %984 }
0x1bf1   :  { %v987_v29 = vmul.f32 %v1456_v19, %v985_v28 }
0x1bf3   :  { %989 = vrot.lane.b32.xlu0 %v987_v29, %s1543_s29 }
0x1c65   :  { %v990_v30 = vpop.permute.xlu0 %989 }
0x1c66   :  { %v992_v31 = vadd.f32 %v1458_v24, %v990_v30 }
0x1c68   :  { %v993_v32 = vsub.f32 %v992_v31, %v911_v60 }
0x1c6a   :  { %v999_v34 = vmul.f32 %v997_v33, %v993_v32 }
0x1c6c   :  { %1001 = vrot.lane.b32.xlu1 %v999_v34, %s1539_s2 }
0x1cde   :  { %v1002_v35 = vpop.permute.xlu1 %1001 }
0x1cdf   :  { %v1004_v36 = vadd.f32 %v1002_v35, %v899_v59 }
0x1ce1   :  { %1006 = vst.msk [vmem:[#allocation8 + $0x30] sm:$0xff] %vm246_vm2, %v1004_v36  ;;  %1015 = vrot.lane.b32.xlu1 %v1004_v36, %s1539_s2  ;;  %1012 = vrot.lane.b32.xlu0 %v1004_v36, %s1543_s29 }
0x1d53   :  { %v1016_v37 = vpop.permute.xlu1 %1015  ;;  %v1013_v38 = vpop.permute.xlu0 %1012 }
0x1d54   :  { %v1018_v39 = vsel %vm246_vm2, %v1004_v36, %v1013_v38 }
0x1d55   :  { %v1019_v5 = vsel %vm248_vm3, %v1018_v39, %v1016_v37 }
0x1d56   :  { %v1020_v6 = vmul.f32 %v1019_v5, %v1696_v17 }
0x1d58   :  { %v1021_v40 = vpack.c.bf16 %v1020_v6, %v1020_v6 }
0x1d5a   :  { %1385 = vmatmul.mubr.msk.bf16.vlgmr.msra.gmra.mrb[20].mxu0 %vm137_vm1, %v1021_v40 }
0x1e2d   :  { %v1059_v41 = vpop.f32.mrb[20].mxu0 }
0x1e2e   :  { %1073 = vrot.lane.b32.xlu0 %v1059_v41, %s1539_s2  ;;  %v1386_v42 = vpop.f32.mrb[21].mxu0  ;;  %v1065_v11 = vadd.f32 %v1059_v41, %v1010_v44 }
0x1e2f   :  { %v1062_v9 = vpop.f32.mrb[22].mxu0 }
0x1e30   :  { %v1387_v43 = vpop.f32.mrb[23].mxu0  ;;  %v1173_v45 = vmul.f32 -1.442695, %v1065_v11 }
0x1e32   :  { %1459 = vpow2.f32 %v1173_v45 }
0x1e3c   :  { %v1460_v46 = vpop.eup %1459 }
0x1e3d   :  { %v1069_v13 = vadd.f32 1.0, %v1460_v46 }
0x1e3f   :  { %1461 = vrcp.f32 %v1069_v13 }
0x1e49   :  { %v1462_v0 = vpop.eup %1461 }
0x1ea0   :  { %v1074_v15 = vpop.permute.xlu0 %1073 }
0x1ea1   :  { %v1076_v47 = vmul.f32 %v1462_v0, %v1074_v15 }
0x1ea3   :  { %1078 = vrot.lane.b32.xlu1 %v1076_v47, %s1539_s2 }
0x1f15   :  { %v1079_v17 = vpop.permute.xlu1 %1078 }
0x1f16   :  { %v1081_v48 = vadd.f32 %v1079_v17, %v1010_v44 }
0x1f18   :  { %1463 = vtanh.f32 %v1081_v48 }
0x1f22   :  { %v1464_v49 = vpop.eup %1463 }
0x1f23   :  { %1084 = vrot.lane.b32.xlu0 %v1464_v49, %s1539_s2 }
0x1f27   :  { %1101 = vperm.xlu0 %1399, %v1171_v50  }
0x1f95   :  { %v1085_v51 = vpop.permute.xlu0 %1084 }
0x1f96   :  { %v1087_v52 = vsub.f32 %v1004_v36, %v1085_v51 }
0x1f98   :  { %1089 = vrot.lane.b32.xlu1 %v1087_v52, %s1543_s29 }
0x1fa6   :  { %v1102_v58 = vpop.permute.xlu0 %1101 }
0x200a   :  { %v1090_v53 = vpop.permute.xlu1 %1089 }
0x200b   :  { %v1092_v54 = vmul.f32 %v1462_v0, %v1090_v53 }
0x200d   :  { %1094 = vrot.lane.b32.xlu1 %v1092_v54, %s1543_s29 }
0x207f   :  { %v1095_v55 = vpop.permute.xlu1 %1094 }
0x2080   :  { %v1097_v56 = vadd.f32 %v1464_v49, %v1095_v55 }
0x2082   :  { %v1098_v57 = vsub.f32 %v1097_v56, %v1016_v37 }
0x2084   :  { %v1104_v59 = vmul.f32 %v1102_v58, %v1098_v57 }
0x2086   :  { %1106 = vrot.lane.b32.xlu0 %v1104_v59, %s1539_s2 }
0x20f8   :  { %v1107_v60 = vpop.permute.xlu0 %1106 }
0x20f9   :  { %v1109_v61 = vadd.f32 %v1107_v60, %v1004_v36 }
0x20fb   :  { %1111 = vst.msk [vmem:[#allocation8 + $0x38] sm:$0xff] %vm246_vm2, %v1109_v61 }
0x20fc   :  { %1520 = shalt.err (!%p1517_p6)
}
0x20fd   :  { %s1521_s18 = scalar_lea.hbm %s1971_s7, 1024 }
0x20fe   :  { %p1522_p7 = scmp.ne.s32.totalorder %s1971_s7, %s1521_s18  ;;  %p1525_p8 = scmp.lt.u32.totalorder %s1521_s18, %s1971_s7 }
0x2100   :  { %p1527_p9 = pnand %p1525_p8, %p1522_p7 }
0x2102   :  { %1530 = shalt.err (!%p1527_p9)
}
0x2103   :  { %s1546_s5 = smov 128   ;;  %s1547_s21 = smov 8  }
0x2104   :  { %1123 = dma.vmem_to_hbm [thread:$0]  %s1118_s16, 1024, %s1971_s7, [#allocation5], %s1546_s5, %s1546_s5, %s1547_s21  }
0x2105   :  { %1535 = dma.done.wait [#allocation5], 1024  }
0x2106   :  { %1536 = vsyncadd [#allocation5], 4294966272 }
0x2107   :  { %1127 = vsyncpa [#allocation4], 1 }
0x2108   :  { %1128 = vsyncpa [#allocation7], 1 }
0x2109   :  { %1129 = vsyncpa [#allocation5], 1 }

</bundles_post_ra>
